<compile_context>
chip_gen: v5e
topology: v5e:2x2
jax: 0.10.0
libtpu: 0.0.40
codegen_flags: <defaults>
</compile_context>

<pallas_src>
import functools
import math

import jax
import jax.numpy as jnp
import numpy as np
from jax.experimental import pallas as pl
from jax.experimental.pallas import tpu as pltpu


# ----------------------------- The single fused kernel -----------------------------

def _bert_predictor_kernel(B, S, L, nh, dh, eps, scale,
                           ids_ref, mask_ref, block_bias_ref,
                           static_emb_ref, word_emb_ref, emb_g_ref, emb_b_ref,
                           wqkv_ref, bqkv_ref, wo_ref, bo_ref, ln1g_ref, ln1b_ref,
                           wi_ref, bi_ref, wo2_ref, bo2_ref, ln2g_ref, ln2b_ref,
                           pool_w_ref, pool_b_ref,
                           m1_ref, c1_ref, m2_ref, c2_ref, m3_ref, c3_ref, m4_ref, c4_ref,
                           out_ref):
    M = B * S
    H = nh * dh
    V = word_emb_ref.shape[0]

    def layernorm(t, g, b):
        mu = jnp.mean(t, axis=-1, keepdims=True)
        tc = t - mu
        var = jnp.mean(tc * tc, axis=-1, keepdims=True)
        return tc * jax.lax.rsqrt(var + eps) * g + b

    def mm(a, b):
        return jnp.dot(a, b, preferred_element_type=jnp.float32)

    # --- embeddings: one-hot token gather on the MXU + precombined pos/type + LayerNorm ---
    onehot = (jax.lax.broadcasted_iota(jnp.int32, (M, V), 1) == ids_ref[...]).astype(jnp.float32)
    emb = mm(onehot, word_emb_ref[...]) + static_emb_ref[...]
    x = layernorm(emb, emb_g_ref[...], emb_b_ref[...])          # (M, H), stays in VMEM/vregs

    # --- additive attention bias: static cross-batch block mask + runtime key padding ---
    bias = block_bias_ref[...] + (1.0 - mask_ref[...]) * -10000.0   # (M, M)

    # --- encoder layers (statically unrolled) ---
    for l in range(L):
        # Fused QKV projection: one (M, H) x (H, 3H) matmul.
        qkv = mm(x, wqkv_ref[l]) + bqkv_ref[l]

        # Per-head attention on in-register values; contexts are concatenated so the
        # output projection is a single (M, H) x (H, H) matmul.
        # TODO(synk): a single (3,nh,M,dh) relayout of qkv would remove the width-8 lane slices.
        ctxs = []
        for h in range(nh):
            qh = qkv[:, h * dh:(h + 1) * dh]
            kh = qkv[:, H + h * dh:H + (h + 1) * dh]
            vh = qkv[:, 2 * H + h * dh:2 * H + (h + 1) * dh]
            s = jax.lax.dot_general(qh, kh, (((1,), (1,)), ((), ())),
                                    preferred_element_type=jnp.float32) * scale + bias
            s = s - jnp.max(s, axis=-1, keepdims=True)
            p = jnp.exp(s)
            p = p * pl.reciprocal(jnp.sum(p, axis=-1, keepdims=True), approx=True)
            ctxs.append(mm(p, vh))
        ctx = jnp.concatenate(ctxs, axis=-1)                     # (M, H)
        attn = mm(ctx, wo_ref[l]) + bo_ref[l]
        x = layernorm(attn + x, ln1g_ref[l], ln1b_ref[l])

        inter = mm(x, wi_ref[l]) + bi_ref[l]
        # TODO(synk): HF BERT default GELU is the exact erf form; tanh approximation used here.
        inter = 0.5 * inter * (1.0 + jnp.tanh(0.7978845608028654 *
                                              (inter + 0.044715 * inter * inter * inter)))
        ffn = mm(inter, wo2_ref[l]) + bo2_ref[l]
        x = layernorm(ffn + x, ln2g_ref[l], ln2b_ref[l])

    # --- pooler on CLS rows + (fc folded into deconv1) + dense deconv tail ---
    cls = jnp.concatenate([x[b * S:b * S + 1, :] for b in range(B)], axis=0)   # (B, H)
    pooled = jnp.tanh(mm(cls, pool_w_ref[...]) + pool_b_ref[...])
    y = jnp.maximum(mm(pooled, m1_ref[...]) + c1_ref[...], 0.0)   # fc + deconv1 + ReLU
    y = jnp.maximum(mm(y, m2_ref[...]) + c2_ref[...], 0.0)        # deconv2 + ReLU
    y = jnp.maximum(mm(y, m3_ref[...]) + c3_ref[...], 0.0)        # deconv3 + ReLU
    y = mm(y, m4_ref[...]) + c4_ref[...]                          # deconv4 (no ReLU)
    out_ref[...] = y.astype(out_ref.dtype)                        # (B, 256) lane-dense slab


# ------------------- One-time weight prep (outside the jitted forward) -------------------

def _deconv_as_matrix(w_t, Hi, Wi, stride=2, padding=1, output_padding=1):
    """ConvTranspose2d(Cin, Cout, 3, stride, padding, output_padding) as a dense
    (Cin*Hi*Wi, Cout*Ho*Wo) matrix acting on row-major flattened NCHW inputs.
    out[co,y,x] = sum_{ci,ky,kx} in[ci,i,j] * w[ci,co,ky,kx] with y=i*s-p+ky, x=j*s-p+kx."""
    Cin, Cout, k, _ = w_t.shape
    Ho = (Hi - 1) * stride - 2 * padding + k + output_padding
    Wo = (Wi - 1) * stride - 2 * padding + k + output_padding
    sel_y = np.zeros((Hi, k, Ho), np.float32)
    sel_x = np.zeros((Wi, k, Wo), np.float32)
    for i in range(Hi):
        for ky in range(k):
            y = i * stride - padding + ky
            if 0 <= y < Ho:
                sel_y[i, ky, y] = 1.0
    for j in range(Wi):
        for kx in range(k):
            x = j * stride - padding + kx
            if 0 <= x < Wo:
                sel_x[j, kx, x] = 1.0
    m = jnp.einsum("abkl,ikp,jlq->aijbpq", w_t, jnp.asarray(sel_y), jnp.asarray(sel_x))
    return m.reshape(Cin * Hi * Wi, Cout * Ho * Wo), (Cout, Ho, Wo)


def prepare_inference_arrays(params, cfg, B, S):
    """One-time parameter transform -> flat tuple of kernel-ready arrays (runs eagerly once)."""
    H, I, L = cfg["hidden"], cfg["inter"], cfg["layers"]
    M = B * S

    # Position + token-type (=0) embeddings are data-independent: pre-combine once.
    static_emb = jnp.tile(params["pos_emb"][:S], (B, 1)) + params["type_emb"][0][None, :]

    # Static cross-batch block mask for the flattened (M, M) attention.
    seg = np.repeat(np.arange(B), S)
    block_bias = jnp.asarray(
        np.where(seg[:, None] == seg[None, :], 0.0, -1e9).astype(np.float32))

    # Pre-lower the ConvTranspose2d stack to dense matrices (data-independent, one-time).
    mats, cvecs = [], []
    Hi = Wi = 1
    out_dims = (1, 1, 1)
    for w_t, b in params["deconv"]:
        m, (Cout, Ho, Wo) = _deconv_as_matrix(w_t, Hi, Wi)
        mats.append(m)
        cvecs.append(jnp.broadcast_to(b[:, None, None], (Cout, Ho, Wo)).reshape(1, -1))
        Hi, Wi = Ho, Wo
        out_dims = (Cout, Ho, Wo)

    # Fold the fc layer into the first deconv matrix (no nonlinearity in between).
    m1 = params["fc_w"] @ mats[0]                            # (H, 16)
    c1 = params["fc_b"][None, :] @ mats[0] + cvecs[0]        # (1, 16)

    enc = params["enc"]
    arrays = (
        static_emb, params["word_emb"],
        params["emb_ln_g"].reshape(1, H), params["emb_ln_b"].reshape(1, H),
        enc["wqkv"], enc["bqkv"].reshape(L, 1, 3 * H),
        enc["wo"], enc["bo"].reshape(L, 1, H),
        enc["ln1_g"].reshape(L, 1, H), enc["ln1_b"].reshape(L, 1, H),
        enc["wi"], enc["bi"].reshape(L, 1, I),
        enc["wo2"], enc["bo2"].reshape(L, 1, H),
        enc["ln2_g"].reshape(L, 1, H), enc["ln2_b"].reshape(L, 1, H),
        params["pool_w"], params["pool_b"].reshape(1, H),
        m1, c1, mats[1], cvecs[1], mats[2], cvecs[2], mats[3], cvecs[3],
    )
    return block_bias, arrays, out_dims


# ----------------------------- Parameters -----------------------------

def init_params(key, cfg):
    H, I, V, P = cfg["hidden"], cfg["inter"], cfg["vocab"], cfg["max_pos"]
    L, T = cfg["layers"], 2
    keys = iter(jax.random.split(key, 64))

    def nrm(shape):
        return 0.02 * jax.random.normal(next(keys), shape, jnp.float32)

    params = {
        "word_emb": nrm((V, H)),
        "pos_emb": nrm((P, H)),
        "type_emb": nrm((T, H)),
        "emb_ln_g": jnp.ones((H,), jnp.float32),
        "emb_ln_b": jnp.zeros((H,), jnp.float32),
        "enc": {
            # stacked per-layer weights; QKV concatenated into one (H, 3H) projection
            "wqkv": nrm((L, H, 3 * H)), "bqkv": jnp.zeros((L, 3 * H), jnp.float32),
            "wo": nrm((L, H, H)), "bo": jnp.zeros((L, H), jnp.float32),
            "ln1_g": jnp.ones((L, H), jnp.float32), "ln1_b": jnp.zeros((L, H), jnp.float32),
            "wi": nrm((L, H, I)), "bi": jnp.zeros((L, I), jnp.float32),
            "wo2": nrm((L, I, H)), "bo2": jnp.zeros((L, H), jnp.float32),
            "ln2_g": jnp.ones((L, H), jnp.float32), "ln2_b": jnp.zeros((L, H), jnp.float32),
        },
        "pool_w": nrm((H, H)), "pool_b": jnp.zeros((H,), jnp.float32),
        "fc_w": nrm((H, 8)), "fc_b": jnp.zeros((8,), jnp.float32),
    }
    # ConvTranspose2d weights in PyTorch layout (Cin, Cout, 3, 3)
    deconv_channels = [(8, 4), (4, 2), (2, 1), (1, 1)]
    params["deconv"] = [(nrm((ci, co, 3, 3)), jnp.zeros((co,), jnp.float32))
                        for ci, co in deconv_channels]
    return params


# ----------------------------- Forward pass (one pallas_call) -----------------------------

def bert_predictor_forward(block_bias, arrays, input_ids, attention_mask, *, cfg, out_dims):
    B, S = input_ids.shape
    M = B * S
    H, nh, L = cfg["hidden"], cfg["heads"], cfg["layers"]
    dh = H // nh
    Cout, Ho, Wo = out_dims
    out_dim = Cout * Ho * Wo

    # Contiguous reshapes only (layout metadata), no gathers / mask math in the XLA graph.
    ids_col = input_ids.reshape(M, 1).astype(jnp.int32)
    mask_row = attention_mask.reshape(1, M).astype(jnp.float32)

    kernel = functools.partial(_bert_predictor_kernel, B, S, L, nh, dh,
                               1e-12, 1.0 / math.sqrt(dh))
    out_flat = pl.pallas_call(
        kernel,
        out_shape=jax.ShapeDtypeStruct((B, out_dim), jnp.float32),
    )(ids_col, mask_row, block_bias, *arrays)

    return out_flat.reshape(B, Cout, Ho, Wo)                   # (B, 1, 16, 16)


# ----------------------------- Main -----------------------------

if __name__ == "__main__":
    cfg = dict(hidden=32, heads=4, layers=2, inter=64, vocab=50, max_pos=32)
    key = jax.random.PRNGKey(0)
    pkey, ikey = jax.random.split(key)
    params = init_params(pkey, cfg)

    B, S = 2, 8
    block_bias, arrays, out_dims = prepare_inference_arrays(params, cfg, B, S)

    input_ids = jax.random.randint(ikey, (B, S), 0, cfg["vocab"], dtype=jnp.int32)
    attention_mask = jnp.ones((B, S), jnp.int32).at[1, 6:].set(0)   # some padding on row 1

    fwd = jax.jit(functools.partial(bert_predictor_forward, cfg=cfg, out_dims=out_dims))
    out = fwd(block_bias, arrays, input_ids, attention_mask)
    jax.block_until_ready(out)
    assert out.shape == (B, 1, 16, 16), out.shape
    assert out.dtype == jnp.float32
    assert bool(jnp.all(jnp.isfinite(out)))
    print("KERNEL_OK")
</pallas_src>

<mosaic_0001>
module attributes {stable_mosaic.version = 11 : i64} {
  func.func @_bert_predictor_kernel(%arg0: memref<16x1xi32, #tpu.memory_space<vmem>>, %arg1: memref<1x16xf32, #tpu.memory_space<vmem>>, %arg2: memref<16x16xf32, #tpu.memory_space<vmem>>, %arg3: memref<16x32xf32, #tpu.memory_space<vmem>>, %arg4: memref<50x32xf32, #tpu.memory_space<vmem>>, %arg5: memref<1x32xf32, #tpu.memory_space<vmem>>, %arg6: memref<1x32xf32, #tpu.memory_space<vmem>>, %arg7: memref<2x32x96xf32, #tpu.memory_space<vmem>>, %arg8: memref<2x1x96xf32, #tpu.memory_space<vmem>>, %arg9: memref<2x32x32xf32, #tpu.memory_space<vmem>>, %arg10: memref<2x1x32xf32, #tpu.memory_space<vmem>>, %arg11: memref<2x1x32xf32, #tpu.memory_space<vmem>>, %arg12: memref<2x1x32xf32, #tpu.memory_space<vmem>>, %arg13: memref<2x32x64xf32, #tpu.memory_space<vmem>>, %arg14: memref<2x1x64xf32, #tpu.memory_space<vmem>>, %arg15: memref<2x64x32xf32, #tpu.memory_space<vmem>>, %arg16: memref<2x1x32xf32, #tpu.memory_space<vmem>>, %arg17: memref<2x1x32xf32, #tpu.memory_space<vmem>>, %arg18: memref<2x1x32xf32, #tpu.memory_space<vmem>>, %arg19: memref<32x32xf32, #tpu.memory_space<vmem>>, %arg20: memref<1x32xf32, #tpu.memory_space<vmem>>, %arg21: memref<32x16xf32, #tpu.memory_space<vmem>>, %arg22: memref<1x16xf32, #tpu.memory_space<vmem>>, %arg23: memref<16x32xf32, #tpu.memory_space<vmem>>, %arg24: memref<1x32xf32, #tpu.memory_space<vmem>>, %arg25: memref<32x64xf32, #tpu.memory_space<vmem>>, %arg26: memref<1x64xf32, #tpu.memory_space<vmem>>, %arg27: memref<64x256xf32, #tpu.memory_space<vmem>>, %arg28: memref<1x256xf32, #tpu.memory_space<vmem>>, %arg29: memref<2x256xf32, #tpu.memory_space<vmem>>) attributes {dimension_semantics = [], scalar_prefetch = 0 : i64, scratch_operands = 0 : i64, tpu.core_type = #tpu.core_type<tc>} {
    %0 = tpu.iota {dimensions = array<i32: 1>} : vector<16x50xi32>
    %c0 = arith.constant 0 : index
    %c0_0 = arith.constant 0 : index
    %1 = vector.load %arg0[%c0, %c0_0] : memref<16x1xi32, #tpu.memory_space<vmem>>, vector<16x1xi32>
    %2 = vector.broadcast %1 : vector<16x1xi32> to vector<16x50xi32>
    %3 = arith.cmpi eq, %0, %2 : vector<16x50xi32>
    %4 = arith.extui %3 : vector<16x50xi1> to vector<16x50xi32>
    %5 = arith.sitofp %4 : vector<16x50xi32> to vector<16x50xf32>
    %c0_1 = arith.constant 0 : index
    %c0_2 = arith.constant 0 : index
    %6 = vector.load %arg4[%c0_1, %c0_2] : memref<50x32xf32, #tpu.memory_space<vmem>>, vector<50x32xf32>
    %cst = arith.constant dense<0.000000e+00> : vector<16x32xf32>
    %7 = tpu.matmul %5, %6, %cst {dimension_numbers = #tpu.dot_dimension_numbers<[1], [0], [0], [1], [0, 0, 1, 1], [], []>} : vector<16x50xf32>, vector<50x32xf32>, vector<16x32xf32> -> vector<16x32xf32>
    %c0_3 = arith.constant 0 : index
    %c0_4 = arith.constant 0 : index
    %8 = vector.load %arg3[%c0_3, %c0_4] : memref<16x32xf32, #tpu.memory_space<vmem>>, vector<16x32xf32>
    %9 = arith.addf %7, %8 : vector<16x32xf32>
    %c0_5 = arith.constant 0 : index
    %c0_6 = arith.constant 0 : index
    %10 = vector.load %arg5[%c0_5, %c0_6] : memref<1x32xf32, #tpu.memory_space<vmem>>, vector<1x32xf32>
    %c0_7 = arith.constant 0 : index
    %c0_8 = arith.constant 0 : index
    %11 = vector.load %arg6[%c0_7, %c0_8] : memref<1x32xf32, #tpu.memory_space<vmem>>, vector<1x32xf32>
    %cst_9 = arith.constant dense<0.000000e+00> : vector<16xf32>
    %12 = vector.multi_reduction <add>, %9, %cst_9 [1] : vector<16x32xf32> to vector<16xf32>
    %13 = vector.shape_cast %12 : vector<16xf32> to vector<16x1xf32>
    %cst_10 = arith.constant 3.200000e+01 : f32
    %14 = vector.broadcast %cst_10 : f32 to vector<16x1xf32>
    %15 = arith.divf %13, %14 : vector<16x1xf32>
    %16 = vector.broadcast %15 : vector<16x1xf32> to vector<16x32xf32>
    %17 = arith.subf %9, %16 : vector<16x32xf32>
    %18 = arith.mulf %17, %17 : vector<16x32xf32>
    %cst_11 = arith.constant dense<0.000000e+00> : vector<16xf32>
    %19 = vector.multi_reduction <add>, %18, %cst_11 [1] : vector<16x32xf32> to vector<16xf32>
    %20 = vector.shape_cast %19 : vector<16xf32> to vector<16x1xf32>
    %cst_12 = arith.constant 3.200000e+01 : f32
    %21 = vector.broadcast %cst_12 : f32 to vector<16x1xf32>
    %22 = arith.divf %20, %21 : vector<16x1xf32>
    %cst_13 = arith.constant 9.99999996E-13 : f32
    %23 = vector.broadcast %cst_13 : f32 to vector<16x1xf32>
    %24 = arith.addf %22, %23 : vector<16x1xf32>
    %25 = math.rsqrt %24 : vector<16x1xf32>
    %26 = vector.broadcast %25 : vector<16x1xf32> to vector<16x32xf32>
    %27 = arith.mulf %17, %26 : vector<16x32xf32>
    %28 = vector.broadcast %10 : vector<1x32xf32> to vector<16x32xf32>
    %29 = arith.mulf %27, %28 : vector<16x32xf32>
    %30 = vector.broadcast %11 : vector<1x32xf32> to vector<16x32xf32>
    %31 = arith.addf %29, %30 : vector<16x32xf32>
    %c0_14 = arith.constant 0 : index
    %c0_15 = arith.constant 0 : index
    %32 = vector.load %arg2[%c0_14, %c0_15] : memref<16x16xf32, #tpu.memory_space<vmem>>, vector<16x16xf32>
    %c0_16 = arith.constant 0 : index
    %c0_17 = arith.constant 0 : index
    %33 = vector.load %arg1[%c0_16, %c0_17] : memref<1x16xf32, #tpu.memory_space<vmem>>, vector<1x16xf32>
    %cst_18 = arith.constant 1.000000e+00 : f32
    %34 = vector.broadcast %cst_18 : f32 to vector<1x16xf32>
    %35 = arith.subf %34, %33 : vector<1x16xf32>
    %cst_19 = arith.constant -1.000000e+04 : f32
    %36 = vector.broadcast %cst_19 : f32 to vector<1x16xf32>
    %37 = arith.mulf %35, %36 : vector<1x16xf32>
    %38 = vector.broadcast %37 : vector<1x16xf32> to vector<16x16xf32>
    %39 = arith.addf %32, %38 : vector<16x16xf32>
    %c0_20 = arith.constant 0 : index
    %c0_21 = arith.constant 0 : index
    %c0_22 = arith.constant 0 : index
    %40 = vector.load %arg7[%c0_20, %c0_21, %c0_22] : memref<2x32x96xf32, #tpu.memory_space<vmem>>, vector<1x32x96xf32>
    %41 = vector.shape_cast %40 : vector<1x32x96xf32> to vector<32x96xf32>
    %cst_23 = arith.constant dense<0.000000e+00> : vector<16x96xf32>
    %42 = tpu.matmul %31, %41, %cst_23 {dimension_numbers = #tpu.dot_dimension_numbers<[1], [0], [0], [1], [0, 0, 1, 1], [], []>} : vector<16x32xf32>, vector<32x96xf32>, vector<16x96xf32> -> vector<16x96xf32>
    %c0_24 = arith.constant 0 : index
    %c0_25 = arith.constant 0 : index
    %c0_26 = arith.constant 0 : index
    %43 = vector.load %arg8[%c0_24, %c0_25, %c0_26] : memref<2x1x96xf32, #tpu.memory_space<vmem>>, vector<1x1x96xf32>
    %44 = vector.shape_cast %43 : vector<1x1x96xf32> to vector<1x96xf32>
    %45 = vector.broadcast %44 : vector<1x96xf32> to vector<16x96xf32>
    %46 = arith.addf %42, %45 : vector<16x96xf32>
    %47 = vector.extract_strided_slice %46 {offsets = [0, 0], sizes = [16, 8], strides = [1, 1]} : vector<16x96xf32> to vector<16x8xf32>
    %48 = vector.extract_strided_slice %46 {offsets = [0, 32], sizes = [16, 8], strides = [1, 1]} : vector<16x96xf32> to vector<16x8xf32>
    %49 = vector.extract_strided_slice %46 {offsets = [0, 64], sizes = [16, 8], strides = [1, 1]} : vector<16x96xf32> to vector<16x8xf32>
    %cst_27 = arith.constant dense<0.000000e+00> : vector<16x16xf32>
    %50 = tpu.matmul %47, %48, %cst_27 {dimension_numbers = #tpu.dot_dimension_numbers<[1], [1], [0], [0], [0, 0, 1, 0], [], []>} : vector<16x8xf32>, vector<16x8xf32>, vector<16x16xf32> -> vector<16x16xf32>
    %cst_28 = arith.constant 0.353553385 : f32
    %51 = vector.broadcast %cst_28 : f32 to vector<16x16xf32>
    %52 = arith.mulf %50, %51 : vector<16x16xf32>
    %53 = arith.addf %52, %39 : vector<16x16xf32>
    %cst_29 = arith.constant dense<0xFF800000> : vector<16xf32>
    %54 = vector.multi_reduction <maximumf>, %53, %cst_29 [1] : vector<16x16xf32> to vector<16xf32>
    %55 = vector.shape_cast %54 : vector<16xf32> to vector<16x1xf32>
    %56 = vector.broadcast %55 : vector<16x1xf32> to vector<16x16xf32>
    %57 = arith.subf %53, %56 : vector<16x16xf32>
    %58 = math.exp %57 : vector<16x16xf32>
    %cst_30 = arith.constant dense<0.000000e+00> : vector<16xf32>
    %59 = vector.multi_reduction <add>, %58, %cst_30 [1] : vector<16x16xf32> to vector<16xf32>
    %60 = vector.shape_cast %59 : vector<16xf32> to vector<16x1xf32>
    %61 = tpu.reciprocal %60 {approx = true} : vector<16x1xf32> -> vector<16x1xf32>
    %62 = vector.broadcast %61 : vector<16x1xf32> to vector<16x16xf32>
    %63 = arith.mulf %58, %62 : vector<16x16xf32>
    %cst_31 = arith.constant dense<0.000000e+00> : vector<16x8xf32>
    %64 = tpu.matmul %63, %49, %cst_31 {dimension_numbers = #tpu.dot_dimension_numbers<[1], [0], [0], [1], [0, 0, 1, 1], [], []>} : vector<16x16xf32>, vector<16x8xf32>, vector<16x8xf32> -> vector<16x8xf32>
    %65 = vector.extract_strided_slice %46 {offsets = [0, 8], sizes = [16, 8], strides = [1, 1]} : vector<16x96xf32> to vector<16x8xf32>
    %66 = vector.extract_strided_slice %46 {offsets = [0, 40], sizes = [16, 8], strides = [1, 1]} : vector<16x96xf32> to vector<16x8xf32>
    %67 = vector.extract_strided_slice %46 {offsets = [0, 72], sizes = [16, 8], strides = [1, 1]} : vector<16x96xf32> to vector<16x8xf32>
    %cst_32 = arith.constant dense<0.000000e+00> : vector<16x16xf32>
    %68 = tpu.matmul %65, %66, %cst_32 {dimension_numbers = #tpu.dot_dimension_numbers<[1], [1], [0], [0], [0, 0, 1, 0], [], []>} : vector<16x8xf32>, vector<16x8xf32>, vector<16x16xf32> -> vector<16x16xf32>
    %cst_33 = arith.constant 0.353553385 : f32
    %69 = vector.broadcast %cst_33 : f32 to vector<16x16xf32>
    %70 = arith.mulf %68, %69 : vector<16x16xf32>
    %71 = arith.addf %70, %39 : vector<16x16xf32>
    %cst_34 = arith.constant dense<0xFF800000> : vector<16xf32>
    %72 = vector.multi_reduction <maximumf>, %71, %cst_34 [1] : vector<16x16xf32> to vector<16xf32>
    %73 = vector.shape_cast %72 : vector<16xf32> to vector<16x1xf32>
    %74 = vector.broadcast %73 : vector<16x1xf32> to vector<16x16xf32>
    %75 = arith.subf %71, %74 : vector<16x16xf32>
    %76 = math.exp %75 : vector<16x16xf32>
    %cst_35 = arith.constant dense<0.000000e+00> : vector<16xf32>
    %77 = vector.multi_reduction <add>, %76, %cst_35 [1] : vector<16x16xf32> to vector<16xf32>
    %78 = vector.shape_cast %77 : vector<16xf32> to vector<16x1xf32>
    %79 = tpu.reciprocal %78 {approx = true} : vector<16x1xf32> -> vector<16x1xf32>
    %80 = vector.broadcast %79 : vector<16x1xf32> to vector<16x16xf32>
    %81 = arith.mulf %76, %80 : vector<16x16xf32>
    %cst_36 = arith.constant dense<0.000000e+00> : vector<16x8xf32>
    %82 = tpu.matmul %81, %67, %cst_36 {dimension_numbers = #tpu.dot_dimension_numbers<[1], [0], [0], [1], [0, 0, 1, 1], [], []>} : vector<16x16xf32>, vector<16x8xf32>, vector<16x8xf32> -> vector<16x8xf32>
    %83 = vector.extract_strided_slice %46 {offsets = [0, 16], sizes = [16, 8], strides = [1, 1]} : vector<16x96xf32> to vector<16x8xf32>
    %84 = vector.extract_strided_slice %46 {offsets = [0, 48], sizes = [16, 8], strides = [1, 1]} : vector<16x96xf32> to vector<16x8xf32>
    %85 = vector.extract_strided_slice %46 {offsets = [0, 80], sizes = [16, 8], strides = [1, 1]} : vector<16x96xf32> to vector<16x8xf32>
    %cst_37 = arith.constant dense<0.000000e+00> : vector<16x16xf32>
    %86 = tpu.matmul %83, %84, %cst_37 {dimension_numbers = #tpu.dot_dimension_numbers<[1], [1], [0], [0], [0, 0, 1, 0], [], []>} : vector<16x8xf32>, vector<16x8xf32>, vector<16x16xf32> -> vector<16x16xf32>
    %cst_38 = arith.constant 0.353553385 : f32
    %87 = vector.broadcast %cst_38 : f32 to vector<16x16xf32>
    %88 = arith.mulf %86, %87 : vector<16x16xf32>
    %89 = arith.addf %88, %39 : vector<16x16xf32>
    %cst_39 = arith.constant dense<0xFF800000> : vector<16xf32>
    %90 = vector.multi_reduction <maximumf>, %89, %cst_39 [1] : vector<16x16xf32> to vector<16xf32>
    %91 = vector.shape_cast %90 : vector<16xf32> to vector<16x1xf32>
    %92 = vector.broadcast %91 : vector<16x1xf32> to vector<16x16xf32>
    %93 = arith.subf %89, %92 : vector<16x16xf32>
    %94 = math.exp %93 : vector<16x16xf32>
    %cst_40 = arith.constant dense<0.000000e+00> : vector<16xf32>
    %95 = vector.multi_reduction <add>, %94, %cst_40 [1] : vector<16x16xf32> to vector<16xf32>
    %96 = vector.shape_cast %95 : vector<16xf32> to vector<16x1xf32>
    %97 = tpu.reciprocal %96 {approx = true} : vector<16x1xf32> -> vector<16x1xf32>
    %98 = vector.broadcast %97 : vector<16x1xf32> to vector<16x16xf32>
    %99 = arith.mulf %94, %98 : vector<16x16xf32>
    %cst_41 = arith.constant dense<0.000000e+00> : vector<16x8xf32>
    %100 = tpu.matmul %99, %85, %cst_41 {dimension_numbers = #tpu.dot_dimension_numbers<[1], [0], [0], [1], [0, 0, 1, 1], [], []>} : vector<16x16xf32>, vector<16x8xf32>, vector<16x8xf32> -> vector<16x8xf32>
    %101 = vector.extract_strided_slice %46 {offsets = [0, 24], sizes = [16, 8], strides = [1, 1]} : vector<16x96xf32> to vector<16x8xf32>
    %102 = vector.extract_strided_slice %46 {offsets = [0, 56], sizes = [16, 8], strides = [1, 1]} : vector<16x96xf32> to vector<16x8xf32>
    %103 = vector.extract_strided_slice %46 {offsets = [0, 88], sizes = [16, 8], strides = [1, 1]} : vector<16x96xf32> to vector<16x8xf32>
    %cst_42 = arith.constant dense<0.000000e+00> : vector<16x16xf32>
    %104 = tpu.matmul %101, %102, %cst_42 {dimension_numbers = #tpu.dot_dimension_numbers<[1], [1], [0], [0], [0, 0, 1, 0], [], []>} : vector<16x8xf32>, vector<16x8xf32>, vector<16x16xf32> -> vector<16x16xf32>
    %cst_43 = arith.constant 0.353553385 : f32
    %105 = vector.broadcast %cst_43 : f32 to vector<16x16xf32>
    %106 = arith.mulf %104, %105 : vector<16x16xf32>
    %107 = arith.addf %106, %39 : vector<16x16xf32>
    %cst_44 = arith.constant dense<0xFF800000> : vector<16xf32>
    %108 = vector.multi_reduction <maximumf>, %107, %cst_44 [1] : vector<16x16xf32> to vector<16xf32>
    %109 = vector.shape_cast %108 : vector<16xf32> to vector<16x1xf32>
    %110 = vector.broadcast %109 : vector<16x1xf32> to vector<16x16xf32>
    %111 = arith.subf %107, %110 : vector<16x16xf32>
    %112 = math.exp %111 : vector<16x16xf32>
    %cst_45 = arith.constant dense<0.000000e+00> : vector<16xf32>
    %113 = vector.multi_reduction <add>, %112, %cst_45 [1] : vector<16x16xf32> to vector<16xf32>
    %114 = vector.shape_cast %113 : vector<16xf32> to vector<16x1xf32>
    %115 = tpu.reciprocal %114 {approx = true} : vector<16x1xf32> -> vector<16x1xf32>
    %116 = vector.broadcast %115 : vector<16x1xf32> to vector<16x16xf32>
    %117 = arith.mulf %112, %116 : vector<16x16xf32>
    %cst_46 = arith.constant dense<0.000000e+00> : vector<16x8xf32>
    %118 = tpu.matmul %117, %103, %cst_46 {dimension_numbers = #tpu.dot_dimension_numbers<[1], [0], [0], [1], [0, 0, 1, 1], [], []>} : vector<16x16xf32>, vector<16x8xf32>, vector<16x8xf32> -> vector<16x8xf32>
    %119 = tpu.concatenate %64, %82, %100, %118 in 1 : vector<16x8xf32>, vector<16x8xf32>, vector<16x8xf32>, vector<16x8xf32> -> vector<16x32xf32>
    %c0_47 = arith.constant 0 : index
    %c0_48 = arith.constant 0 : index
    %c0_49 = arith.constant 0 : index
    %120 = vector.load %arg9[%c0_47, %c0_48, %c0_49] : memref<2x32x32xf32, #tpu.memory_space<vmem>>, vector<1x32x32xf32>
    %121 = vector.shape_cast %120 : vector<1x32x32xf32> to vector<32x32xf32>
    %cst_50 = arith.constant dense<0.000000e+00> : vector<16x32xf32>
    %122 = tpu.matmul %119, %121, %cst_50 {dimension_numbers = #tpu.dot_dimension_numbers<[1], [0], [0], [1], [0, 0, 1, 1], [], []>} : vector<16x32xf32>, vector<32x32xf32>, vector<16x32xf32> -> vector<16x32xf32>
    %c0_51 = arith.constant 0 : index
    %c0_52 = arith.constant 0 : index
    %c0_53 = arith.constant 0 : index
    %123 = vector.load %arg10[%c0_51, %c0_52, %c0_53] : memref<2x1x32xf32, #tpu.memory_space<vmem>>, vector<1x1x32xf32>
    %124 = vector.shape_cast %123 : vector<1x1x32xf32> to vector<1x32xf32>
    %125 = vector.broadcast %124 : vector<1x32xf32> to vector<16x32xf32>
    %126 = arith.addf %122, %125 : vector<16x32xf32>
    %127 = arith.addf %126, %31 : vector<16x32xf32>
    %c0_54 = arith.constant 0 : index
    %c0_55 = arith.constant 0 : index
    %c0_56 = arith.constant 0 : index
    %128 = vector.load %arg11[%c0_54, %c0_55, %c0_56] : memref<2x1x32xf32, #tpu.memory_space<vmem>>, vector<1x1x32xf32>
    %129 = vector.shape_cast %128 : vector<1x1x32xf32> to vector<1x32xf32>
    %c0_57 = arith.constant 0 : index
    %c0_58 = arith.constant 0 : index
    %c0_59 = arith.constant 0 : index
    %130 = vector.load %arg12[%c0_57, %c0_58, %c0_59] : memref<2x1x32xf32, #tpu.memory_space<vmem>>, vector<1x1x32xf32>
    %131 = vector.shape_cast %130 : vector<1x1x32xf32> to vector<1x32xf32>
    %cst_60 = arith.constant dense<0.000000e+00> : vector<16xf32>
    %132 = vector.multi_reduction <add>, %127, %cst_60 [1] : vector<16x32xf32> to vector<16xf32>
    %133 = vector.shape_cast %132 : vector<16xf32> to vector<16x1xf32>
    %cst_61 = arith.constant 3.200000e+01 : f32
    %134 = vector.broadcast %cst_61 : f32 to vector<16x1xf32>
    %135 = arith.divf %133, %134 : vector<16x1xf32>
    %136 = vector.broadcast %135 : vector<16x1xf32> to vector<16x32xf32>
    %137 = arith.subf %127, %136 : vector<16x32xf32>
    %138 = arith.mulf %137, %137 : vector<16x32xf32>
    %cst_62 = arith.constant dense<0.000000e+00> : vector<16xf32>
    %139 = vector.multi_reduction <add>, %138, %cst_62 [1] : vector<16x32xf32> to vector<16xf32>
    %140 = vector.shape_cast %139 : vector<16xf32> to vector<16x1xf32>
    %cst_63 = arith.constant 3.200000e+01 : f32
    %141 = vector.broadcast %cst_63 : f32 to vector<16x1xf32>
    %142 = arith.divf %140, %141 : vector<16x1xf32>
    %cst_64 = arith.constant 9.99999996E-13 : f32
    %143 = vector.broadcast %cst_64 : f32 to vector<16x1xf32>
    %144 = arith.addf %142, %143 : vector<16x1xf32>
    %145 = math.rsqrt %144 : vector<16x1xf32>
    %146 = vector.broadcast %145 : vector<16x1xf32> to vector<16x32xf32>
    %147 = arith.mulf %137, %146 : vector<16x32xf32>
    %148 = vector.broadcast %129 : vector<1x32xf32> to vector<16x32xf32>
    %149 = arith.mulf %147, %148 : vector<16x32xf32>
    %150 = vector.broadcast %131 : vector<1x32xf32> to vector<16x32xf32>
    %151 = arith.addf %149, %150 : vector<16x32xf32>
    %c0_65 = arith.constant 0 : index
    %c0_66 = arith.constant 0 : index
    %c0_67 = arith.constant 0 : index
    %152 = vector.load %arg13[%c0_65, %c0_66, %c0_67] : memref<2x32x64xf32, #tpu.memory_space<vmem>>, vector<1x32x64xf32>
    %153 = vector.shape_cast %152 : vector<1x32x64xf32> to vector<32x64xf32>
    %cst_68 = arith.constant dense<0.000000e+00> : vector<16x64xf32>
    %154 = tpu.matmul %151, %153, %cst_68 {dimension_numbers = #tpu.dot_dimension_numbers<[1], [0], [0], [1], [0, 0, 1, 1], [], []>} : vector<16x32xf32>, vector<32x64xf32>, vector<16x64xf32> -> vector<16x64xf32>
    %c0_69 = arith.constant 0 : index
    %c0_70 = arith.constant 0 : index
    %c0_71 = arith.constant 0 : index
    %155 = vector.load %arg14[%c0_69, %c0_70, %c0_71] : memref<2x1x64xf32, #tpu.memory_space<vmem>>, vector<1x1x64xf32>
    %156 = vector.shape_cast %155 : vector<1x1x64xf32> to vector<1x64xf32>
    %157 = vector.broadcast %156 : vector<1x64xf32> to vector<16x64xf32>
    %158 = arith.addf %154, %157 : vector<16x64xf32>
    %cst_72 = arith.constant 5.000000e-01 : f32
    %159 = vector.broadcast %cst_72 : f32 to vector<16x64xf32>
    %160 = arith.mulf %159, %158 : vector<16x64xf32>
    %cst_73 = arith.constant 4.471500e-02 : f32
    %161 = vector.broadcast %cst_73 : f32 to vector<16x64xf32>
    %162 = arith.mulf %161, %158 : vector<16x64xf32>
    %163 = arith.mulf %162, %158 : vector<16x64xf32>
    %164 = arith.mulf %163, %158 : vector<16x64xf32>
    %165 = arith.addf %158, %164 : vector<16x64xf32>
    %cst_74 = arith.constant 0.797884583 : f32
    %166 = vector.broadcast %cst_74 : f32 to vector<16x64xf32>
    %167 = arith.mulf %166, %165 : vector<16x64xf32>
    %168 = math.tanh %167 : vector<16x64xf32>
    %cst_75 = arith.constant 1.000000e+00 : f32
    %169 = vector.broadcast %cst_75 : f32 to vector<16x64xf32>
    %170 = arith.addf %169, %168 : vector<16x64xf32>
    %171 = arith.mulf %160, %170 : vector<16x64xf32>
    %c0_76 = arith.constant 0 : index
    %c0_77 = arith.constant 0 : index
    %c0_78 = arith.constant 0 : index
    %172 = vector.load %arg15[%c0_76, %c0_77, %c0_78] : memref<2x64x32xf32, #tpu.memory_space<vmem>>, vector<1x64x32xf32>
    %173 = vector.shape_cast %172 : vector<1x64x32xf32> to vector<64x32xf32>
    %cst_79 = arith.constant dense<0.000000e+00> : vector<16x32xf32>
    %174 = tpu.matmul %171, %173, %cst_79 {dimension_numbers = #tpu.dot_dimension_numbers<[1], [0], [0], [1], [0, 0, 1, 1], [], []>} : vector<16x64xf32>, vector<64x32xf32>, vector<16x32xf32> -> vector<16x32xf32>
    %c0_80 = arith.constant 0 : index
    %c0_81 = arith.constant 0 : index
    %c0_82 = arith.constant 0 : index
    %175 = vector.load %arg16[%c0_80, %c0_81, %c0_82] : memref<2x1x32xf32, #tpu.memory_space<vmem>>, vector<1x1x32xf32>
    %176 = vector.shape_cast %175 : vector<1x1x32xf32> to vector<1x32xf32>
    %177 = vector.broadcast %176 : vector<1x32xf32> to vector<16x32xf32>
    %178 = arith.addf %174, %177 : vector<16x32xf32>
    %179 = arith.addf %178, %151 : vector<16x32xf32>
    %c0_83 = arith.constant 0 : index
    %c0_84 = arith.constant 0 : index
    %c0_85 = arith.constant 0 : index
    %180 = vector.load %arg17[%c0_83, %c0_84, %c0_85] : memref<2x1x32xf32, #tpu.memory_space<vmem>>, vector<1x1x32xf32>
    %181 = vector.shape_cast %180 : vector<1x1x32xf32> to vector<1x32xf32>
    %c0_86 = arith.constant 0 : index
    %c0_87 = arith.constant 0 : index
    %c0_88 = arith.constant 0 : index
    %182 = vector.load %arg18[%c0_86, %c0_87, %c0_88] : memref<2x1x32xf32, #tpu.memory_space<vmem>>, vector<1x1x32xf32>
    %183 = vector.shape_cast %182 : vector<1x1x32xf32> to vector<1x32xf32>
    %cst_89 = arith.constant dense<0.000000e+00> : vector<16xf32>
    %184 = vector.multi_reduction <add>, %179, %cst_89 [1] : vector<16x32xf32> to vector<16xf32>
    %185 = vector.shape_cast %184 : vector<16xf32> to vector<16x1xf32>
    %cst_90 = arith.constant 3.200000e+01 : f32
    %186 = vector.broadcast %cst_90 : f32 to vector<16x1xf32>
    %187 = arith.divf %185, %186 : vector<16x1xf32>
    %188 = vector.broadcast %187 : vector<16x1xf32> to vector<16x32xf32>
    %189 = arith.subf %179, %188 : vector<16x32xf32>
    %190 = arith.mulf %189, %189 : vector<16x32xf32>
    %cst_91 = arith.constant dense<0.000000e+00> : vector<16xf32>
    %191 = vector.multi_reduction <add>, %190, %cst_91 [1] : vector<16x32xf32> to vector<16xf32>
    %192 = vector.shape_cast %191 : vector<16xf32> to vector<16x1xf32>
    %cst_92 = arith.constant 3.200000e+01 : f32
    %193 = vector.broadcast %cst_92 : f32 to vector<16x1xf32>
    %194 = arith.divf %192, %193 : vector<16x1xf32>
    %cst_93 = arith.constant 9.99999996E-13 : f32
    %195 = vector.broadcast %cst_93 : f32 to vector<16x1xf32>
    %196 = arith.addf %194, %195 : vector<16x1xf32>
    %197 = math.rsqrt %196 : vector<16x1xf32>
    %198 = vector.broadcast %197 : vector<16x1xf32> to vector<16x32xf32>
    %199 = arith.mulf %189, %198 : vector<16x32xf32>
    %200 = vector.broadcast %181 : vector<1x32xf32> to vector<16x32xf32>
    %201 = arith.mulf %199, %200 : vector<16x32xf32>
    %202 = vector.broadcast %183 : vector<1x32xf32> to vector<16x32xf32>
    %203 = arith.addf %201, %202 : vector<16x32xf32>
    %c1 = arith.constant 1 : index
    %c0_94 = arith.constant 0 : index
    %c0_95 = arith.constant 0 : index
    %204 = vector.load %arg7[%c1, %c0_94, %c0_95] : memref<2x32x96xf32, #tpu.memory_space<vmem>>, vector<1x32x96xf32>
    %205 = vector.shape_cast %204 : vector<1x32x96xf32> to vector<32x96xf32>
    %cst_96 = arith.constant dense<0.000000e+00> : vector<16x96xf32>
    %206 = tpu.matmul %203, %205, %cst_96 {dimension_numbers = #tpu.dot_dimension_numbers<[1], [0], [0], [1], [0, 0, 1, 1], [], []>} : vector<16x32xf32>, vector<32x96xf32>, vector<16x96xf32> -> vector<16x96xf32>
    %c1_97 = arith.constant 1 : index
    %c0_98 = arith.constant 0 : index
    %c0_99 = arith.constant 0 : index
    %207 = vector.load %arg8[%c1_97, %c0_98, %c0_99] : memref<2x1x96xf32, #tpu.memory_space<vmem>>, vector<1x1x96xf32>
    %208 = vector.shape_cast %207 : vector<1x1x96xf32> to vector<1x96xf32>
    %209 = vector.broadcast %208 : vector<1x96xf32> to vector<16x96xf32>
    %210 = arith.addf %206, %209 : vector<16x96xf32>
    %211 = vector.extract_strided_slice %210 {offsets = [0, 0], sizes = [16, 8], strides = [1, 1]} : vector<16x96xf32> to vector<16x8xf32>
    %212 = vector.extract_strided_slice %210 {offsets = [0, 32], sizes = [16, 8], strides = [1, 1]} : vector<16x96xf32> to vector<16x8xf32>
    %213 = vector.extract_strided_slice %210 {offsets = [0, 64], sizes = [16, 8], strides = [1, 1]} : vector<16x96xf32> to vector<16x8xf32>
    %cst_100 = arith.constant dense<0.000000e+00> : vector<16x16xf32>
    %214 = tpu.matmul %211, %212, %cst_100 {dimension_numbers = #tpu.dot_dimension_numbers<[1], [1], [0], [0], [0, 0, 1, 0], [], []>} : vector<16x8xf32>, vector<16x8xf32>, vector<16x16xf32> -> vector<16x16xf32>
    %cst_101 = arith.constant 0.353553385 : f32
    %215 = vector.broadcast %cst_101 : f32 to vector<16x16xf32>
    %216 = arith.mulf %214, %215 : vector<16x16xf32>
    %217 = arith.addf %216, %39 : vector<16x16xf32>
    %cst_102 = arith.constant dense<0xFF800000> : vector<16xf32>
    %218 = vector.multi_reduction <maximumf>, %217, %cst_102 [1] : vector<16x16xf32> to vector<16xf32>
    %219 = vector.shape_cast %218 : vector<16xf32> to vector<16x1xf32>
    %220 = vector.broadcast %219 : vector<16x1xf32> to vector<16x16xf32>
    %221 = arith.subf %217, %220 : vector<16x16xf32>
    %222 = math.exp %221 : vector<16x16xf32>
    %cst_103 = arith.constant dense<0.000000e+00> : vector<16xf32>
    %223 = vector.multi_reduction <add>, %222, %cst_103 [1] : vector<16x16xf32> to vector<16xf32>
    %224 = vector.shape_cast %223 : vector<16xf32> to vector<16x1xf32>
    %225 = tpu.reciprocal %224 {approx = true} : vector<16x1xf32> -> vector<16x1xf32>
    %226 = vector.broadcast %225 : vector<16x1xf32> to vector<16x16xf32>
    %227 = arith.mulf %222, %226 : vector<16x16xf32>
    %cst_104 = arith.constant dense<0.000000e+00> : vector<16x8xf32>
    %228 = tpu.matmul %227, %213, %cst_104 {dimension_numbers = #tpu.dot_dimension_numbers<[1], [0], [0], [1], [0, 0, 1, 1], [], []>} : vector<16x16xf32>, vector<16x8xf32>, vector<16x8xf32> -> vector<16x8xf32>
    %229 = vector.extract_strided_slice %210 {offsets = [0, 8], sizes = [16, 8], strides = [1, 1]} : vector<16x96xf32> to vector<16x8xf32>
    %230 = vector.extract_strided_slice %210 {offsets = [0, 40], sizes = [16, 8], strides = [1, 1]} : vector<16x96xf32> to vector<16x8xf32>
    %231 = vector.extract_strided_slice %210 {offsets = [0, 72], sizes = [16, 8], strides = [1, 1]} : vector<16x96xf32> to vector<16x8xf32>
    %cst_105 = arith.constant dense<0.000000e+00> : vector<16x16xf32>
    %232 = tpu.matmul %229, %230, %cst_105 {dimension_numbers = #tpu.dot_dimension_numbers<[1], [1], [0], [0], [0, 0, 1, 0], [], []>} : vector<16x8xf32>, vector<16x8xf32>, vector<16x16xf32> -> vector<16x16xf32>
    %cst_106 = arith.constant 0.353553385 : f32
    %233 = vector.broadcast %cst_106 : f32 to vector<16x16xf32>
    %234 = arith.mulf %232, %233 : vector<16x16xf32>
    %235 = arith.addf %234, %39 : vector<16x16xf32>
    %cst_107 = arith.constant dense<0xFF800000> : vector<16xf32>
    %236 = vector.multi_reduction <maximumf>, %235, %cst_107 [1] : vector<16x16xf32> to vector<16xf32>
    %237 = vector.shape_cast %236 : vector<16xf32> to vector<16x1xf32>
    %238 = vector.broadcast %237 : vector<16x1xf32> to vector<16x16xf32>
    %239 = arith.subf %235, %238 : vector<16x16xf32>
    %240 = math.exp %239 : vector<16x16xf32>
    %cst_108 = arith.constant dense<0.000000e+00> : vector<16xf32>
    %241 = vector.multi_reduction <add>, %240, %cst_108 [1] : vector<16x16xf32> to vector<16xf32>
    %242 = vector.shape_cast %241 : vector<16xf32> to vector<16x1xf32>
    %243 = tpu.reciprocal %242 {approx = true} : vector<16x1xf32> -> vector<16x1xf32>
    %244 = vector.broadcast %243 : vector<16x1xf32> to vector<16x16xf32>
    %245 = arith.mulf %240, %244 : vector<16x16xf32>
    %cst_109 = arith.constant dense<0.000000e+00> : vector<16x8xf32>
    %246 = tpu.matmul %245, %231, %cst_109 {dimension_numbers = #tpu.dot_dimension_numbers<[1], [0], [0], [1], [0, 0, 1, 1], [], []>} : vector<16x16xf32>, vector<16x8xf32>, vector<16x8xf32> -> vector<16x8xf32>
    %247 = vector.extract_strided_slice %210 {offsets = [0, 16], sizes = [16, 8], strides = [1, 1]} : vector<16x96xf32> to vector<16x8xf32>
    %248 = vector.extract_strided_slice %210 {offsets = [0, 48], sizes = [16, 8], strides = [1, 1]} : vector<16x96xf32> to vector<16x8xf32>
    %249 = vector.extract_strided_slice %210 {offsets = [0, 80], sizes = [16, 8], strides = [1, 1]} : vector<16x96xf32> to vector<16x8xf32>
    %cst_110 = arith.constant dense<0.000000e+00> : vector<16x16xf32>
    %250 = tpu.matmul %247, %248, %cst_110 {dimension_numbers = #tpu.dot_dimension_numbers<[1], [1], [0], [0], [0, 0, 1, 0], [], []>} : vector<16x8xf32>, vector<16x8xf32>, vector<16x16xf32> -> vector<16x16xf32>
    %cst_111 = arith.constant 0.353553385 : f32
    %251 = vector.broadcast %cst_111 : f32 to vector<16x16xf32>
    %252 = arith.mulf %250, %251 : vector<16x16xf32>
    %253 = arith.addf %252, %39 : vector<16x16xf32>
    %cst_112 = arith.constant dense<0xFF800000> : vector<16xf32>
    %254 = vector.multi_reduction <maximumf>, %253, %cst_112 [1] : vector<16x16xf32> to vector<16xf32>
    %255 = vector.shape_cast %254 : vector<16xf32> to vector<16x1xf32>
    %256 = vector.broadcast %255 : vector<16x1xf32> to vector<16x16xf32>
    %257 = arith.subf %253, %256 : vector<16x16xf32>
    %258 = math.exp %257 : vector<16x16xf32>
    %cst_113 = arith.constant dense<0.000000e+00> : vector<16xf32>
    %259 = vector.multi_reduction <add>, %258, %cst_113 [1] : vector<16x16xf32> to vector<16xf32>
    %260 = vector.shape_cast %259 : vector<16xf32> to vector<16x1xf32>
    %261 = tpu.reciprocal %260 {approx = true} : vector<16x1xf32> -> vector<16x1xf32>
    %262 = vector.broadcast %261 : vector<16x1xf32> to vector<16x16xf32>
    %263 = arith.mulf %258, %262 : vector<16x16xf32>
    %cst_114 = arith.constant dense<0.000000e+00> : vector<16x8xf32>
    %264 = tpu.matmul %263, %249, %cst_114 {dimension_numbers = #tpu.dot_dimension_numbers<[1], [0], [0], [1], [0, 0, 1, 1], [], []>} : vector<16x16xf32>, vector<16x8xf32>, vector<16x8xf32> -> vector<16x8xf32>
    %265 = vector.extract_strided_slice %210 {offsets = [0, 24], sizes = [16, 8], strides = [1, 1]} : vector<16x96xf32> to vector<16x8xf32>
    %266 = vector.extract_strided_slice %210 {offsets = [0, 56], sizes = [16, 8], strides = [1, 1]} : vector<16x96xf32> to vector<16x8xf32>
    %267 = vector.extract_strided_slice %210 {offsets = [0, 88], sizes = [16, 8], strides = [1, 1]} : vector<16x96xf32> to vector<16x8xf32>
    %cst_115 = arith.constant dense<0.000000e+00> : vector<16x16xf32>
    %268 = tpu.matmul %265, %266, %cst_115 {dimension_numbers = #tpu.dot_dimension_numbers<[1], [1], [0], [0], [0, 0, 1, 0], [], []>} : vector<16x8xf32>, vector<16x8xf32>, vector<16x16xf32> -> vector<16x16xf32>
    %cst_116 = arith.constant 0.353553385 : f32
    %269 = vector.broadcast %cst_116 : f32 to vector<16x16xf32>
    %270 = arith.mulf %268, %269 : vector<16x16xf32>
    %271 = arith.addf %270, %39 : vector<16x16xf32>
    %cst_117 = arith.constant dense<0xFF800000> : vector<16xf32>
    %272 = vector.multi_reduction <maximumf>, %271, %cst_117 [1] : vector<16x16xf32> to vector<16xf32>
    %273 = vector.shape_cast %272 : vector<16xf32> to vector<16x1xf32>
    %274 = vector.broadcast %273 : vector<16x1xf32> to vector<16x16xf32>
    %275 = arith.subf %271, %274 : vector<16x16xf32>
    %276 = math.exp %275 : vector<16x16xf32>
    %cst_118 = arith.constant dense<0.000000e+00> : vector<16xf32>
    %277 = vector.multi_reduction <add>, %276, %cst_118 [1] : vector<16x16xf32> to vector<16xf32>
    %278 = vector.shape_cast %277 : vector<16xf32> to vector<16x1xf32>
    %279 = tpu.reciprocal %278 {approx = true} : vector<16x1xf32> -> vector<16x1xf32>
    %280 = vector.broadcast %279 : vector<16x1xf32> to vector<16x16xf32>
    %281 = arith.mulf %276, %280 : vector<16x16xf32>
    %cst_119 = arith.constant dense<0.000000e+00> : vector<16x8xf32>
    %282 = tpu.matmul %281, %267, %cst_119 {dimension_numbers = #tpu.dot_dimension_numbers<[1], [0], [0], [1], [0, 0, 1, 1], [], []>} : vector<16x16xf32>, vector<16x8xf32>, vector<16x8xf32> -> vector<16x8xf32>
    %283 = tpu.concatenate %228, %246, %264, %282 in 1 : vector<16x8xf32>, vector<16x8xf32>, vector<16x8xf32>, vector<16x8xf32> -> vector<16x32xf32>
    %c1_120 = arith.constant 1 : index
    %c0_121 = arith.constant 0 : index
    %c0_122 = arith.constant 0 : index
    %284 = vector.load %arg9[%c1_120, %c0_121, %c0_122] : memref<2x32x32xf32, #tpu.memory_space<vmem>>, vector<1x32x32xf32>
    %285 = vector.shape_cast %284 : vector<1x32x32xf32> to vector<32x32xf32>
    %cst_123 = arith.constant dense<0.000000e+00> : vector<16x32xf32>
    %286 = tpu.matmul %283, %285, %cst_123 {dimension_numbers = #tpu.dot_dimension_numbers<[1], [0], [0], [1], [0, 0, 1, 1], [], []>} : vector<16x32xf32>, vector<32x32xf32>, vector<16x32xf32> -> vector<16x32xf32>
    %c1_124 = arith.constant 1 : index
    %c0_125 = arith.constant 0 : index
    %c0_126 = arith.constant 0 : index
    %287 = vector.load %arg10[%c1_124, %c0_125, %c0_126] : memref<2x1x32xf32, #tpu.memory_space<vmem>>, vector<1x1x32xf32>
    %288 = vector.shape_cast %287 : vector<1x1x32xf32> to vector<1x32xf32>
    %289 = vector.broadcast %288 : vector<1x32xf32> to vector<16x32xf32>
    %290 = arith.addf %286, %289 : vector<16x32xf32>
    %291 = arith.addf %290, %203 : vector<16x32xf32>
    %c1_127 = arith.constant 1 : index
    %c0_128 = arith.constant 0 : index
    %c0_129 = arith.constant 0 : index
    %292 = vector.load %arg11[%c1_127, %c0_128, %c0_129] : memref<2x1x32xf32, #tpu.memory_space<vmem>>, vector<1x1x32xf32>
    %293 = vector.shape_cast %292 : vector<1x1x32xf32> to vector<1x32xf32>
    %c1_130 = arith.constant 1 : index
    %c0_131 = arith.constant 0 : index
    %c0_132 = arith.constant 0 : index
    %294 = vector.load %arg12[%c1_130, %c0_131, %c0_132] : memref<2x1x32xf32, #tpu.memory_space<vmem>>, vector<1x1x32xf32>
    %295 = vector.shape_cast %294 : vector<1x1x32xf32> to vector<1x32xf32>
    %cst_133 = arith.constant dense<0.000000e+00> : vector<16xf32>
    %296 = vector.multi_reduction <add>, %291, %cst_133 [1] : vector<16x32xf32> to vector<16xf32>
    %297 = vector.shape_cast %296 : vector<16xf32> to vector<16x1xf32>
    %cst_134 = arith.constant 3.200000e+01 : f32
    %298 = vector.broadcast %cst_134 : f32 to vector<16x1xf32>
    %299 = arith.divf %297, %298 : vector<16x1xf32>
    %300 = vector.broadcast %299 : vector<16x1xf32> to vector<16x32xf32>
    %301 = arith.subf %291, %300 : vector<16x32xf32>
    %302 = arith.mulf %301, %301 : vector<16x32xf32>
    %cst_135 = arith.constant dense<0.000000e+00> : vector<16xf32>
    %303 = vector.multi_reduction <add>, %302, %cst_135 [1] : vector<16x32xf32> to vector<16xf32>
    %304 = vector.shape_cast %303 : vector<16xf32> to vector<16x1xf32>
    %cst_136 = arith.constant 3.200000e+01 : f32
    %305 = vector.broadcast %cst_136 : f32 to vector<16x1xf32>
    %306 = arith.divf %304, %305 : vector<16x1xf32>
    %cst_137 = arith.constant 9.99999996E-13 : f32
    %307 = vector.broadcast %cst_137 : f32 to vector<16x1xf32>
    %308 = arith.addf %306, %307 : vector<16x1xf32>
    %309 = math.rsqrt %308 : vector<16x1xf32>
    %310 = vector.broadcast %309 : vector<16x1xf32> to vector<16x32xf32>
    %311 = arith.mulf %301, %310 : vector<16x32xf32>
    %312 = vector.broadcast %293 : vector<1x32xf32> to vector<16x32xf32>
    %313 = arith.mulf %311, %312 : vector<16x32xf32>
    %314 = vector.broadcast %295 : vector<1x32xf32> to vector<16x32xf32>
    %315 = arith.addf %313, %314 : vector<16x32xf32>
    %c1_138 = arith.constant 1 : index
    %c0_139 = arith.constant 0 : index
    %c0_140 = arith.constant 0 : index
    %316 = vector.load %arg13[%c1_138, %c0_139, %c0_140] : memref<2x32x64xf32, #tpu.memory_space<vmem>>, vector<1x32x64xf32>
    %317 = vector.shape_cast %316 : vector<1x32x64xf32> to vector<32x64xf32>
    %cst_141 = arith.constant dense<0.000000e+00> : vector<16x64xf32>
    %318 = tpu.matmul %315, %317, %cst_141 {dimension_numbers = #tpu.dot_dimension_numbers<[1], [0], [0], [1], [0, 0, 1, 1], [], []>} : vector<16x32xf32>, vector<32x64xf32>, vector<16x64xf32> -> vector<16x64xf32>
    %c1_142 = arith.constant 1 : index
    %c0_143 = arith.constant 0 : index
    %c0_144 = arith.constant 0 : index
    %319 = vector.load %arg14[%c1_142, %c0_143, %c0_144] : memref<2x1x64xf32, #tpu.memory_space<vmem>>, vector<1x1x64xf32>
    %320 = vector.shape_cast %319 : vector<1x1x64xf32> to vector<1x64xf32>
    %321 = vector.broadcast %320 : vector<1x64xf32> to vector<16x64xf32>
    %322 = arith.addf %318, %321 : vector<16x64xf32>
    %cst_145 = arith.constant 5.000000e-01 : f32
    %323 = vector.broadcast %cst_145 : f32 to vector<16x64xf32>
    %324 = arith.mulf %323, %322 : vector<16x64xf32>
    %cst_146 = arith.constant 4.471500e-02 : f32
    %325 = vector.broadcast %cst_146 : f32 to vector<16x64xf32>
    %326 = arith.mulf %325, %322 : vector<16x64xf32>
    %327 = arith.mulf %326, %322 : vector<16x64xf32>
    %328 = arith.mulf %327, %322 : vector<16x64xf32>
    %329 = arith.addf %322, %328 : vector<16x64xf32>
    %cst_147 = arith.constant 0.797884583 : f32
    %330 = vector.broadcast %cst_147 : f32 to vector<16x64xf32>
    %331 = arith.mulf %330, %329 : vector<16x64xf32>
    %332 = math.tanh %331 : vector<16x64xf32>
    %cst_148 = arith.constant 1.000000e+00 : f32
    %333 = vector.broadcast %cst_148 : f32 to vector<16x64xf32>
    %334 = arith.addf %333, %332 : vector<16x64xf32>
    %335 = arith.mulf %324, %334 : vector<16x64xf32>
    %c1_149 = arith.constant 1 : index
    %c0_150 = arith.constant 0 : index
    %c0_151 = arith.constant 0 : index
    %336 = vector.load %arg15[%c1_149, %c0_150, %c0_151] : memref<2x64x32xf32, #tpu.memory_space<vmem>>, vector<1x64x32xf32>
    %337 = vector.shape_cast %336 : vector<1x64x32xf32> to vector<64x32xf32>
    %cst_152 = arith.constant dense<0.000000e+00> : vector<16x32xf32>
    %338 = tpu.matmul %335, %337, %cst_152 {dimension_numbers = #tpu.dot_dimension_numbers<[1], [0], [0], [1], [0, 0, 1, 1], [], []>} : vector<16x64xf32>, vector<64x32xf32>, vector<16x32xf32> -> vector<16x32xf32>
    %c1_153 = arith.constant 1 : index
    %c0_154 = arith.constant 0 : index
    %c0_155 = arith.constant 0 : index
    %339 = vector.load %arg16[%c1_153, %c0_154, %c0_155] : memref<2x1x32xf32, #tpu.memory_space<vmem>>, vector<1x1x32xf32>
    %340 = vector.shape_cast %339 : vector<1x1x32xf32> to vector<1x32xf32>
    %341 = vector.broadcast %340 : vector<1x32xf32> to vector<16x32xf32>
    %342 = arith.addf %338, %341 : vector<16x32xf32>
    %343 = arith.addf %342, %315 : vector<16x32xf32>
    %c1_156 = arith.constant 1 : index
    %c0_157 = arith.constant 0 : index
    %c0_158 = arith.constant 0 : index
    %344 = vector.load %arg17[%c1_156, %c0_157, %c0_158] : memref<2x1x32xf32, #tpu.memory_space<vmem>>, vector<1x1x32xf32>
    %345 = vector.shape_cast %344 : vector<1x1x32xf32> to vector<1x32xf32>
    %c1_159 = arith.constant 1 : index
    %c0_160 = arith.constant 0 : index
    %c0_161 = arith.constant 0 : index
    %346 = vector.load %arg18[%c1_159, %c0_160, %c0_161] : memref<2x1x32xf32, #tpu.memory_space<vmem>>, vector<1x1x32xf32>
    %347 = vector.shape_cast %346 : vector<1x1x32xf32> to vector<1x32xf32>
    %cst_162 = arith.constant dense<0.000000e+00> : vector<16xf32>
    %348 = vector.multi_reduction <add>, %343, %cst_162 [1] : vector<16x32xf32> to vector<16xf32>
    %349 = vector.shape_cast %348 : vector<16xf32> to vector<16x1xf32>
    %cst_163 = arith.constant 3.200000e+01 : f32
    %350 = vector.broadcast %cst_163 : f32 to vector<16x1xf32>
    %351 = arith.divf %349, %350 : vector<16x1xf32>
    %352 = vector.broadcast %351 : vector<16x1xf32> to vector<16x32xf32>
    %353 = arith.subf %343, %352 : vector<16x32xf32>
    %354 = arith.mulf %353, %353 : vector<16x32xf32>
    %cst_164 = arith.constant dense<0.000000e+00> : vector<16xf32>
    %355 = vector.multi_reduction <add>, %354, %cst_164 [1] : vector<16x32xf32> to vector<16xf32>
    %356 = vector.shape_cast %355 : vector<16xf32> to vector<16x1xf32>
    %cst_165 = arith.constant 3.200000e+01 : f32
    %357 = vector.broadcast %cst_165 : f32 to vector<16x1xf32>
    %358 = arith.divf %356, %357 : vector<16x1xf32>
    %cst_166 = arith.constant 9.99999996E-13 : f32
    %359 = vector.broadcast %cst_166 : f32 to vector<16x1xf32>
    %360 = arith.addf %358, %359 : vector<16x1xf32>
    %361 = math.rsqrt %360 : vector<16x1xf32>
    %362 = vector.broadcast %361 : vector<16x1xf32> to vector<16x32xf32>
    %363 = arith.mulf %353, %362 : vector<16x32xf32>
    %364 = vector.broadcast %345 : vector<1x32xf32> to vector<16x32xf32>
    %365 = arith.mulf %363, %364 : vector<16x32xf32>
    %366 = vector.broadcast %347 : vector<1x32xf32> to vector<16x32xf32>
    %367 = arith.addf %365, %366 : vector<16x32xf32>
    %368 = vector.extract_strided_slice %367 {offsets = [0, 0], sizes = [1, 32], strides = [1, 1]} : vector<16x32xf32> to vector<1x32xf32>
    %369 = vector.extract_strided_slice %367 {offsets = [8, 0], sizes = [1, 32], strides = [1, 1]} : vector<16x32xf32> to vector<1x32xf32>
    %370 = tpu.concatenate %368, %369 in 0 : vector<1x32xf32>, vector<1x32xf32> -> vector<2x32xf32>
    %c0_167 = arith.constant 0 : index
    %c0_168 = arith.constant 0 : index
    %371 = vector.load %arg19[%c0_167, %c0_168] : memref<32x32xf32, #tpu.memory_space<vmem>>, vector<32x32xf32>
    %cst_169 = arith.constant dense<0.000000e+00> : vector<2x32xf32>
    %372 = tpu.matmul %370, %371, %cst_169 {dimension_numbers = #tpu.dot_dimension_numbers<[1], [0], [0], [1], [0, 0, 1, 1], [], []>} : vector<2x32xf32>, vector<32x32xf32>, vector<2x32xf32> -> vector<2x32xf32>
    %c0_170 = arith.constant 0 : index
    %c0_171 = arith.constant 0 : index
    %373 = vector.load %arg20[%c0_170, %c0_171] : memref<1x32xf32, #tpu.memory_space<vmem>>, vector<1x32xf32>
    %374 = vector.broadcast %373 : vector<1x32xf32> to vector<2x32xf32>
    %375 = arith.addf %372, %374 : vector<2x32xf32>
    %376 = math.tanh %375 : vector<2x32xf32>
    %c0_172 = arith.constant 0 : index
    %c0_173 = arith.constant 0 : index
    %377 = vector.load %arg21[%c0_172, %c0_173] : memref<32x16xf32, #tpu.memory_space<vmem>>, vector<32x16xf32>
    %cst_174 = arith.constant dense<0.000000e+00> : vector<2x16xf32>
    %378 = tpu.matmul %376, %377, %cst_174 {dimension_numbers = #tpu.dot_dimension_numbers<[1], [0], [0], [1], [0, 0, 1, 1], [], []>} : vector<2x32xf32>, vector<32x16xf32>, vector<2x16xf32> -> vector<2x16xf32>
    %c0_175 = arith.constant 0 : index
    %c0_176 = arith.constant 0 : index
    %379 = vector.load %arg22[%c0_175, %c0_176] : memref<1x16xf32, #tpu.memory_space<vmem>>, vector<1x16xf32>
    %380 = vector.broadcast %379 : vector<1x16xf32> to vector<2x16xf32>
    %381 = arith.addf %378, %380 : vector<2x16xf32>
    %cst_177 = arith.constant 0.000000e+00 : f32
    %382 = vector.broadcast %cst_177 : f32 to vector<2x16xf32>
    %383 = arith.maximumf %381, %382 : vector<2x16xf32>
    %c0_178 = arith.constant 0 : index
    %c0_179 = arith.constant 0 : index
    %384 = vector.load %arg23[%c0_178, %c0_179] : memref<16x32xf32, #tpu.memory_space<vmem>>, vector<16x32xf32>
    %cst_180 = arith.constant dense<0.000000e+00> : vector<2x32xf32>
    %385 = tpu.matmul %383, %384, %cst_180 {dimension_numbers = #tpu.dot_dimension_numbers<[1], [0], [0], [1], [0, 0, 1, 1], [], []>} : vector<2x16xf32>, vector<16x32xf32>, vector<2x32xf32> -> vector<2x32xf32>
    %c0_181 = arith.constant 0 : index
    %c0_182 = arith.constant 0 : index
    %386 = vector.load %arg24[%c0_181, %c0_182] : memref<1x32xf32, #tpu.memory_space<vmem>>, vector<1x32xf32>
    %387 = vector.broadcast %386 : vector<1x32xf32> to vector<2x32xf32>
    %388 = arith.addf %385, %387 : vector<2x32xf32>
    %cst_183 = arith.constant 0.000000e+00 : f32
    %389 = vector.broadcast %cst_183 : f32 to vector<2x32xf32>
    %390 = arith.maximumf %388, %389 : vector<2x32xf32>
    %c0_184 = arith.constant 0 : index
    %c0_185 = arith.constant 0 : index
    %391 = vector.load %arg25[%c0_184, %c0_185] : memref<32x64xf32, #tpu.memory_space<vmem>>, vector<32x64xf32>
    %cst_186 = arith.constant dense<0.000000e+00> : vector<2x64xf32>
    %392 = tpu.matmul %390, %391, %cst_186 {dimension_numbers = #tpu.dot_dimension_numbers<[1], [0], [0], [1], [0, 0, 1, 1], [], []>} : vector<2x32xf32>, vector<32x64xf32>, vector<2x64xf32> -> vector<2x64xf32>
    %c0_187 = arith.constant 0 : index
    %c0_188 = arith.constant 0 : index
    %393 = vector.load %arg26[%c0_187, %c0_188] : memref<1x64xf32, #tpu.memory_space<vmem>>, vector<1x64xf32>
    %394 = vector.broadcast %393 : vector<1x64xf32> to vector<2x64xf32>
    %395 = arith.addf %392, %394 : vector<2x64xf32>
    %cst_189 = arith.constant 0.000000e+00 : f32
    %396 = vector.broadcast %cst_189 : f32 to vector<2x64xf32>
    %397 = arith.maximumf %395, %396 : vector<2x64xf32>
    %c0_190 = arith.constant 0 : index
    %c0_191 = arith.constant 0 : index
    %398 = vector.load %arg27[%c0_190, %c0_191] : memref<64x256xf32, #tpu.memory_space<vmem>>, vector<64x256xf32>
    %cst_192 = arith.constant dense<0.000000e+00> : vector<2x256xf32>
    %399 = tpu.matmul %397, %398, %cst_192 {dimension_numbers = #tpu.dot_dimension_numbers<[1], [0], [0], [1], [0, 0, 1, 1], [], []>} : vector<2x64xf32>, vector<64x256xf32>, vector<2x256xf32> -> vector<2x256xf32>
    %c0_193 = arith.constant 0 : index
    %c0_194 = arith.constant 0 : index
    %400 = vector.load %arg28[%c0_193, %c0_194] : memref<1x256xf32, #tpu.memory_space<vmem>>, vector<1x256xf32>
    %401 = vector.broadcast %400 : vector<1x256xf32> to vector<2x256xf32>
    %402 = arith.addf %399, %401 : vector<2x256xf32>
    %c0_195 = arith.constant 0 : index
    %c0_196 = arith.constant 0 : index
    %403 = vector.load %arg29[%c0_195, %c0_196] : memref<2x256xf32, #tpu.memory_space<vmem>>, vector<2x256xf32>
    tpu.vector_store %arg29[%c0_195, %c0_196], %402 {strides = array<i32>} : memref<2x256xf32, #tpu.memory_space<vmem>>, vector<2x256xf32>,
    return
  }
}

</mosaic_0001>

<bundles_post_ra>
// kernel: bert_predictor_forward.1
= control target key start
LH: loop header
LB: loop body
LE: loop exit
PB: predicated region body
PF: predicated region fallthrough
CT: control target
= control target key end

     0   :  { %s2693_s6 = smov 1   ;;  %s2694_s10 = smov 2   ;;  %s3375_s0 = inlined_call_operand.smem [shape: u32[30], index: -1, kind: input, shape index: {}] }
   0x1   :  { %s2760_s5 = sld [smem:[%s3375_s0]]   ;;  %s2695_s14 = smov 3  }
   0x2   :  { %s2765_s9 = sld [smem:[%s3375_s0 + %s2693_s6]]   ;;  %s2696_s18 = smov 4  }
   0x3   :  { %s2770_s13 = sld [smem:[%s3375_s0 + %s2694_s10]]   ;;  %s2697_s22 = smov 5  }
   0x4   :  { %s2775_s17 = sld [smem:[%s3375_s0 + %s2695_s14]]   ;;  %s2698_s26 = smov 6  }
   0x5   :  { %s2780_s21 = sld [smem:[%s3375_s0 + %s2696_s18]]   ;;  %s2699_s30 = smov 7  }
   0x6   :  { %s2785_s25 = sld [smem:[%s3375_s0 + %s2697_s22]]   ;;  %s2700_s4 = smov 8  }
   0x7   :  { %s2790_s29 = sld [smem:[%s3375_s0 + %s2698_s26]]   ;;  %s2701_s10 = smov 9  }
   0x8   :  { %3385 = sst [smem:[#allocation25_spill]] %s2765_s9  ;;  %s2702_s15 = smov 10  }
   0x9   :  { %3386 = sst [smem:[#allocation26_spill]] %s2770_s13  ;;  %s2703_s20 = smov 11  }
   0xa   :  { %s2795_s3 = sld [smem:[%s3375_s0 + %s2699_s30]]   ;;  %s2704_s26 = smov 12  }
   0xb   :  { %s2800_s8 = sld [smem:[%s3375_s0 + %s2700_s4]]   ;;  %s2705_s1 = smov 13  }
   0xc   :  { %s2805_s14 = sld [smem:[%s3375_s0 + %s2701_s10]]   ;;  %s2706_s7 = smov 14  }
   0xd   :  { %s2810_s19 = sld [smem:[%s3375_s0 + %s2702_s15]]   ;;  %s2707_s15 = smov 15  }
   0xe   :  { %s2815_s24 = sld [smem:[%s3375_s0 + %s2703_s20]]   ;;  %s2708_s22 = smov 16  }
   0xf   :  { %s2820_s30 = sld [smem:[%s3375_s0 + %s2704_s26]]   ;;  %s2709_s28 = smov 17  }
  0x10   :  { %s2825_s6 = sld [smem:[%s3375_s0 + %s2705_s1]]  }
  0x11   :  { %3387 = sst [smem:[#allocation27_spill]] %s2800_s8 }
  0x12   :  { %s2830_s12 = sld [smem:[%s3375_s0 + %s2706_s7]]   ;;  %s2710_s7 = smov 18  }
  0x13   :  { %3388 = sst [smem:[#allocation28_spill]] %s2810_s19 }
  0x14   :  { %s2835_s20 = sld [smem:[%s3375_s0 + %s2707_s15]]   ;;  %s2711_s15 = smov 19  }
  0x15   :  { %s2840_s27 = sld [smem:[%s3375_s0 + %s2708_s22]]   ;;  %s2712_s22 = smov 20  }
  0x16   :  { %s2845_s4 = sld [smem:[%s3375_s0 + %s2709_s28]]   ;;  %s2713_s28 = smov 21  }
  0x17   :  { %s2865_s19 = sld [smem:[%s3375_s0 + %s2713_s28]]   ;;  %s2717_s28 = smov 25  }
  0x18   :  { %3389 = sst [smem:[#allocation29_spill]] %s2830_s12 }
  0x19   :  { %s2850_s12 = sld [smem:[%s3375_s0 + %s2710_s7]]   ;;  %s2714_s7 = smov 22  }
  0x1a   :  { %3390 = sst [smem:[#allocation30_spill]] %s2835_s20 }
  0x1b   :  { %3391 = sst [smem:[#allocation31_spill]] %s2840_s27 }
  0x1c   :  { %s2855_s20 = sld [smem:[%s3375_s0 + %s2711_s15]]   ;;  %s2715_s15 = smov 23  }
  0x1d   :  { %s2860_s27 = sld [smem:[%s3375_s0 + %s2712_s22]]   ;;  %s2716_s22 = smov 24  }
  0x1e   :  { %3394 = sst [smem:[#allocation34_spill]] %s2865_s19 }
  0x1f   :  { %3392 = sst [smem:[#allocation32_spill]] %s2850_s12 }
  0x20   :  { %s2870_s12 = sld [smem:[%s3375_s0 + %s2714_s7]]   ;;  %s2718_s7 = smov 26  }
  0x21   :  { %s2880_s13 = sld [smem:[%s3375_s0 + %s2716_s22]]   ;;  %s2720_s22 = smov 28  }
  0x22   :  { %3393 = sst [smem:[#allocation33_spill]] %s2855_s20 }
  0x23   :  { %s2875_s20 = sld [smem:[%s3375_s0 + %s2715_s15]]   ;;  %s2719_s15 = smov 27  }
  0x24   :  { %s2885_s19 = sld [smem:[%s3375_s0 + %s2717_s28]]   ;;  %s2721_s28 = smov 29  }
  0x25   :  { %s2895_s9 = sld [smem:[%s3375_s0 + %s2719_s15]]  }
  0x26   :  { %3395 = sst [smem:[#allocation35_spill]] %s2870_s12 }
  0x27   :  { %3396 = sst [smem:[#allocation36_spill]] %s2880_s13 }
  0x28   :  { %s2890_s12 = sld [smem:[%s3375_s0 + %s2718_s7]]  }
  0x29   :  { %s2900_s13 = sld [smem:[%s3375_s0 + %s2720_s22]]  }
  0x2a   :  { %s2905_s8 = sld [smem:[%s3375_s0 + %s2721_s28]]  }
  0x2b   :  { %64 = vsyncpa [#allocation3], 0 }
  0x2c   :  { %65 = vsyncpa [#allocation5], 0 }
  0x2d   :  { %66 = vsyncpa [#allocation8], 0 }
  0x2e   :  { %67 = vsyncpa [#allocation11], 0 }
  0x2f   :  { %68 = vsyncpa [#allocation14], 0  ;;  %s96_s7 = sshll.u32 %s2785_s25, 4  ;;  %s97_s7 = int_to_ptr.hbm [resolvable:$true] %s96_s7 }
  0x30   :  { %69 = vsyncpa [#allocation17], 0  ;;  %s2722_s10 = smov [#allocation4]   ;;  %s2417_s15 = sshra.s32 %s97_s7, 4  ;;  %s2418_s15 = int_to_ptr.hbm [resolvable:$true] %s2417_s15 }
  0x31   :  { %s98_s11 = sshll.u32 %s2722_s10, 4  ;;  %s2419_s16 = scalar_lea.hbm %s2418_s15, 1  ;;  %s99_s11 = int_to_ptr.vmem [resolvable:$true] %s98_s11 }
  0x32   :  { %p2420_p0 = scmp.ne.s32.totalorder %s2418_s15, %s2419_s16  ;;  %s2421_s0 = scalar_lea.hbm %s2785_s25, 1 }
  0x33   :  { %p2422_p1 = scmp.lt.s32.totalorder %s2418_s15, %s2785_s25  ;;  %p2423_p2 = scmp.lt.s32.totalorder %s2421_s0, %s2419_s16 }
  0x35   :  { %p2424_p3 = por %p2423_p2, %p2422_p1 }
  0x37   :  { %p2425_p4 = pnand %p2424_p3, %p2420_p0 }
  0x39   :  { %2428 = shalt.err (!%p2425_p4)
}
  0x3a   :  { %101 = dma.hbm_to_vmem [thread:$0]  %s97_s7, 16, %s99_s11, [#allocation5]  }
  0x3b   :  { %s121_s18 = sshll.u32 %s2805_s14, 4  ;;  %s2723_s22 = smov [#allocation7]   ;;  %s122_s18 = int_to_ptr.hbm [resolvable:$true] %s121_s18 }
  0x3c   :  { %s123_s23 = sshll.u32 %s2723_s22, 4  ;;  %s2441_s26 = sshra.s32 %s122_s18, 4  ;;  %s124_s23 = int_to_ptr.vmem [resolvable:$true] %s123_s23  ;;  %s2442_s26 = int_to_ptr.hbm [resolvable:$true] %s2441_s26 }
  0x3d   :  { %s2443_s28 = scalar_lea.hbm %s2442_s26, 64  ;;  %s2445_s1 = scalar_lea.hbm %s2805_s14, 64 }
  0x3e   :  { %p2444_p5 = scmp.ne.s32.totalorder %s2442_s26, %s2443_s28  ;;  %p2446_p6 = scmp.lt.s32.totalorder %s2442_s26, %s2805_s14 }
  0x3f   :  { %p2447_p7 = scmp.lt.s32.totalorder %s2445_s1, %s2443_s28 }
  0x41   :  { %p2448_p8 = por %p2447_p7, %p2446_p6 }
  0x43   :  { %p2449_p9 = pnand %p2448_p8, %p2444_p5 }
  0x45   :  { %2452 = shalt.err (!%p2449_p9)
}
  0x46   :  { %s2724_s25 = smov 128   ;;  %s2725_s2 = smov 8  }
  0x47   :  { %129 = dma.hbm_to_vmem [thread:$0]  %s122_s18, 1024, %s124_s23, [#allocation8], %s2724_s25, %s2724_s25, %s2725_s2  }
  0x48   :  { %s149_s7 = sshll.u32 %s2820_s30, 4  ;;  %s2726_s10 = smov [#allocation10]   ;;  %s150_s7 = int_to_ptr.hbm [resolvable:$true] %s149_s7 }
  0x49   :  { %s151_s11 = sshll.u32 %s2726_s10, 4  ;;  %s181_s14 = sshll.u32 %s2845_s4, 4  ;;  %s152_s11 = int_to_ptr.vmem [resolvable:$true] %s151_s11  ;;  %s182_s14 = int_to_ptr.hbm [resolvable:$true] %s181_s14 }
  0x4a   :  { %s2465_s15 = sshra.s32 %s150_s7, 4  ;;  %s2469_s0 = scalar_lea.hbm %s2820_s30, 2  ;;  %s2466_s15 = int_to_ptr.hbm [resolvable:$true] %s2465_s15 }
  0x4b   :  { %s2467_s16 = scalar_lea.hbm %s2466_s15, 2  ;;  %p2470_p11 = scmp.lt.s32.totalorder %s2466_s15, %s2820_s30 }
  0x4c   :  { %p2468_p10 = scmp.ne.s32.totalorder %s2466_s15, %s2467_s16  ;;  %p2471_p12 = scmp.lt.s32.totalorder %s2469_s0, %s2467_s16 }
  0x4e   :  { %p2472_p13 = por %p2471_p12, %p2470_p11 }
  0x50   :  { %p2473_p0 = pnand %p2472_p13, %p2468_p10 }
  0x52   :  { %2476 = shalt.err (!%p2473_p0)
}
  0x53   :  { %s2727_s22 = smov 16   ;;  %s2728_s18 = smov 1  }
  0x54   :  { %157 = dma.hbm_to_vmem [thread:$0]  %s150_s7, 32, %s152_s11, [#allocation11], %s2727_s22, %s2727_s22, %s2728_s18  }
  0x55   :  { %s2729_s23 = smov [#allocation13]   ;;  %s213_s28 = sshll.u32 %s2875_s20, 4  ;;  %s2924_s28 = int_to_ptr.hbm [resolvable:$true] %s213_s28 }
  0x56   :  { %s183_s26 = sshll.u32 %s2729_s23, 4  ;;  %s2489_s30 = sshra.s32 %s182_s14, 4  ;;  %s184_s26 = int_to_ptr.vmem [resolvable:$true] %s183_s26  ;;  %s2490_s30 = int_to_ptr.hbm [resolvable:$true] %s2489_s30 }
  0x57   :  { %s2491_s1 = scalar_lea.hbm %s2490_s30, 2  ;;  %s2493_s10 = scalar_lea.hbm %s2845_s4, 2 }
  0x58   :  { %p2492_p1 = scmp.ne.s32.totalorder %s2490_s30, %s2491_s1  ;;  %p2494_p2 = scmp.lt.s32.totalorder %s2490_s30, %s2845_s4 }
  0x59   :  { %p2495_p3 = scmp.lt.s32.totalorder %s2493_s10, %s2491_s1 }
  0x5b   :  { %p2496_p4 = por %p2495_p3, %p2494_p2 }
  0x5d   :  { %p2497_p5 = pnand %p2496_p4, %p2492_p1 }
  0x5f   :  { %2500 = shalt.err (!%p2497_p5)
}
  0x60   :  { %189 = dma.hbm_to_vmem [thread:$0]  %s182_s14, 32, %s184_s26, [#allocation14], %s2727_s22, %s2727_s22, %s2728_s18  }
  0x61   :  { %s80_s7 = sshll.u32 %s2775_s17, 4  ;;  %s2730_s11 = smov [#allocation16]   ;;  %s2932_s7 = int_to_ptr.hbm [resolvable:$true] %s80_s7 }
  0x62   :  { %s215_s15 = sshll.u32 %s2730_s11, 4  ;;  %s2513_s16 = sshra.s32 %s2924_s28, 4  ;;  %s216_s15 = int_to_ptr.vmem [resolvable:$true] %s215_s15  ;;  %s2514_s16 = int_to_ptr.hbm [resolvable:$true] %s2513_s16 }
  0x63   :  { %s2515_s4 = scalar_lea.hbm %s2514_s16, 16  ;;  %s2517_s0 = scalar_lea.hbm %s2875_s20, 16 }
  0x64   :  { %p2516_p6 = scmp.ne.s32.totalorder %s2514_s16, %s2515_s4  ;;  %p2518_p7 = scmp.lt.s32.totalorder %s2514_s16, %s2875_s20 }
  0x65   :  { %p2519_p8 = scmp.lt.s32.totalorder %s2517_s0, %s2515_s4 }
  0x67   :  { %p2520_p9 = por %p2519_p8, %p2518_p7 }
  0x69   :  { %p2521_p10 = pnand %p2520_p9, %p2516_p6 }
  0x6b   :  { %2524 = shalt.err (!%p2521_p10)
}
  0x6c   :  { %221 = dma.hbm_to_vmem [thread:$0]  %s2924_s28, 256, %s216_s15, [#allocation17], %s2724_s25, %s2724_s25, %s2725_s2  }
  0x6d   :  { %s2731_s14 = smov [#allocation2]   ;;  %s107_s26 = sshll.u32 %s2790_s29, 4  ;;  %s108_s26 = int_to_ptr.hbm [resolvable:$true] %s107_s26 }
  0x6e   :  { %s82_s23 = sshll.u32 %s2731_s14, 4  ;;  %s2537_s30 = sshra.s32 %s2932_s7, 4  ;;  %s83_s23 = int_to_ptr.vmem [resolvable:$true] %s82_s23  ;;  %s2538_s30 = int_to_ptr.hbm [resolvable:$true] %s2537_s30 }
  0x6f   :  { %s2539_s20 = scalar_lea.hbm %s2538_s30, 16  ;;  %s2541_s1 = scalar_lea.hbm %s2775_s17, 16 }
  0x70   :  { %p2540_p11 = scmp.ne.s32.totalorder %s2538_s30, %s2539_s20  ;;  %p2542_p12 = scmp.lt.s32.totalorder %s2538_s30, %s2775_s17 }
  0x71   :  { %p2543_p13 = scmp.lt.s32.totalorder %s2541_s1, %s2539_s20 }
  0x73   :  { %p2544_p0 = por %p2543_p13, %p2542_p12 }
  0x75   :  { %p2545_p1 = pnand %p2544_p0, %p2540_p11 }
  0x77   :  { %2548 = shalt.err (!%p2545_p1)
}
  0x78   :  { %88 = dma.hbm_to_vmem [thread:$0]  %s2932_s7, 256, %s83_s23, [#allocation3], %s2724_s25, %s2724_s25, %s2725_s2  }
  0x79   :  { %s136_s28 = sshll.u32 %s2815_s24, 4  ;;  %s2732_s10 = smov [#allocation6]   ;;  %s2950_s28 = int_to_ptr.hbm [resolvable:$true] %s136_s28 }
  0x7a   :  { %s109_s11 = sshll.u32 %s2732_s10, 4  ;;  %s2561_s15 = sshra.s32 %s108_s26, 4  ;;  %s110_s11 = int_to_ptr.vmem [resolvable:$true] %s109_s11  ;;  %s2562_s15 = int_to_ptr.hbm [resolvable:$true] %s2561_s15 }
  0x7b   :  { %s2563_s17 = scalar_lea.hbm %s2562_s15, 1  ;;  %s2565_s16 = scalar_lea.hbm %s2790_s29, 1 }
  0x7c   :  { %p2564_p2 = scmp.ne.s32.totalorder %s2562_s15, %s2563_s17  ;;  %p2566_p3 = scmp.lt.s32.totalorder %s2562_s15, %s2790_s29 }
  0x7d   :  { %p2567_p4 = scmp.lt.s32.totalorder %s2565_s16, %s2563_s17 }
  0x7f   :  { %p2568_p5 = por %p2567_p4, %p2566_p3 }
  0x81   :  { %p2569_p6 = pnand %p2568_p5, %p2564_p2 }
  0x83   :  { %2572 = shalt.err (!%p2569_p6)
}
  0x84   :  { %112 = dma.hbm_to_vmem [thread:$0]  %s108_s26, 16, %s110_s11, [#allocation5]  }
  0x85   :  { %s2733_s7 = smov [#allocation9]   ;;  %s162_s0 = sshll.u32 %s2825_s6, 4  ;;  %s2955_s0 = int_to_ptr.hbm [resolvable:$true] %s162_s0 }
  0x86   :  { %s138_s4 = sshll.u32 %s2733_s7, 4  ;;  %s2585_s14 = sshra.s32 %s2950_s28, 4  ;;  %s139_s4 = int_to_ptr.vmem [resolvable:$true] %s138_s4  ;;  %s2586_s14 = int_to_ptr.hbm [resolvable:$true] %s2585_s14 }
  0x87   :  { %s2587_s23 = scalar_lea.hbm %s2586_s14, 2  ;;  %s2589_s29 = scalar_lea.hbm %s2815_s24, 2 }
  0x88   :  { %p2588_p7 = scmp.ne.s32.totalorder %s2586_s14, %s2587_s23  ;;  %p2590_p8 = scmp.lt.s32.totalorder %s2586_s14, %s2815_s24 }
  0x89   :  { %p2591_p9 = scmp.lt.s32.totalorder %s2589_s29, %s2587_s23 }
  0x8b   :  { %p2592_p10 = por %p2591_p9, %p2590_p8 }
  0x8d   :  { %p2593_p11 = pnand %p2592_p10, %p2588_p7 }
  0x8f   :  { %2596 = shalt.err (!%p2593_p11)
}
  0x90   :  { %144 = dma.hbm_to_vmem [thread:$0]  %s2950_s28, 32, %s139_s4, [#allocation8], %s2727_s22, %s2727_s22, %s2728_s18  }
  0x91   :  { %s199_s26 = sshll.u32 %s2860_s27, 4  ;;  %s2734_s30 = smov [#allocation12]   ;;  %s200_s26 = int_to_ptr.hbm [resolvable:$true] %s199_s26 }
  0x92   :  { %s164_s20 = sshll.u32 %s2734_s30, 4  ;;  %s2609_s1 = sshra.s32 %s2955_s0, 4  ;;  %s165_s20 = int_to_ptr.vmem [resolvable:$true] %s164_s20  ;;  %s2610_s1 = int_to_ptr.hbm [resolvable:$true] %s2609_s1 }
  0x93   :  { %s2611_s24 = scalar_lea.hbm %s2610_s1, 64  ;;  %s2613_s10 = scalar_lea.hbm %s2825_s6, 64 }
  0x94   :  { %p2612_p12 = scmp.ne.s32.totalorder %s2610_s1, %s2611_s24  ;;  %p2614_p13 = scmp.lt.s32.totalorder %s2610_s1, %s2825_s6 }
  0x95   :  { %p2615_p0 = scmp.lt.s32.totalorder %s2613_s10, %s2611_s24 }
  0x97   :  { %p2616_p1 = por %p2615_p0, %p2614_p13 }
  0x99   :  { %p2617_p2 = pnand %p2616_p1, %p2612_p12 }
  0x9b   :  { %2620 = shalt.err (!%p2617_p2)
}
  0x9c   :  { %170 = dma.hbm_to_vmem [thread:$0]  %s2955_s0, 1024, %s165_s20, [#allocation11], %s2724_s25, %s2724_s25, %s2725_s2  }
  0x9d   :  { %s2735_s18 = smov [#allocation15]   ;;  %s228_s11 = sshll.u32 %s2885_s19, 4  ;;  %s229_s11 = int_to_ptr.hbm [resolvable:$true] %s228_s11 }
  0x9e   :  { %s201_s28 = sshll.u32 %s2735_s18, 4  ;;  %s2633_s15 = sshra.s32 %s200_s26, 4  ;;  %s202_s28 = int_to_ptr.vmem [resolvable:$true] %s201_s28  ;;  %s2634_s15 = int_to_ptr.hbm [resolvable:$true] %s2633_s15 }
  0x9f   :  { %s2635_s17 = scalar_lea.hbm %s2634_s15, 1  ;;  %s2637_s6 = scalar_lea.hbm %s2860_s27, 1 }
  0xa0   :  { %p2636_p3 = scmp.ne.s32.totalorder %s2634_s15, %s2635_s17  ;;  %p2638_p4 = scmp.lt.s32.totalorder %s2634_s15, %s2860_s27 }
  0xa1   :  { %p2639_p5 = scmp.lt.s32.totalorder %s2637_s6, %s2635_s17 }
  0xa3   :  { %p2640_p6 = por %p2639_p5, %p2638_p4 }
  0xa5   :  { %p2641_p7 = pnand %p2640_p6, %p2636_p3 }
  0xa7   :  { %2644 = shalt.err (!%p2641_p7)
}
  0xa8   :  { %204 = dma.hbm_to_vmem [thread:$0]  %s200_s26, 16, %s202_s28, [#allocation14]  }
  0xa9   :  { %s2736_s16 = smov [#allocation18]   ;;  %s2657_s4 = sshra.s32 %s229_s11, 4  ;;  %s2658_s4 = int_to_ptr.hbm [resolvable:$true] %s2657_s4 }
  0xaa   :  { %s230_s7 = sshll.u32 %s2736_s16, 4  ;;  %s2659_s0 = scalar_lea.hbm %s2658_s4, 32  ;;  %s231_s7 = int_to_ptr.vmem [resolvable:$true] %s230_s7 }
  0xab   :  { %p2660_p8 = scmp.ne.s32.totalorder %s2658_s4, %s2659_s0  ;;  %s2661_s14 = scalar_lea.hbm %s2885_s19, 32 }
  0xac   :  { %p2662_p9 = scmp.lt.s32.totalorder %s2658_s4, %s2885_s19  ;;  %p2663_p10 = scmp.lt.s32.totalorder %s2661_s14, %s2659_s0 }
  0xae   :  { %p2664_p11 = por %p2663_p10, %p2662_p9 }
  0xb0   :  { %p2665_p12 = pnand %p2664_p11, %p2660_p8 }
  0xb2   :  { %2668 = shalt.err (!%p2665_p12)
}
  0xb3   :  { %236 = dma.hbm_to_vmem [thread:$0]  %s229_s11, 512, %s231_s7, [#allocation17], %s2724_s25, %s2724_s25, %s2725_s2  }
  0xb4   :  { %2681 = dma.done.wait [#allocation3], 256  }
  0xb5   :  { %2682 = vsyncadd [#allocation3], 4294967040 }
  0xb6   :  { %2683 = dma.done.wait [#allocation5], 32  }
  0xb7   :  { %2684 = vsyncadd [#allocation5], 4294967264 }
  0xb8   :  { %2685 = dma.done.wait [#allocation8], 1056  }
  0xb9   :  { %2686 = vsyncadd [#allocation8], 4294966240 }
  0xba   :  { %2687 = dma.done.wait [#allocation11], 1056  }
  0xbb   :  { %2688 = vsyncadd [#allocation11], 4294966240 }
  0xbc   :  { %2689 = dma.done.wait [#allocation14], 48  }
  0xbd   :  { %2690 = vsyncadd [#allocation14], 4294967248 }
  0xbe   :  { %2691 = dma.done.wait [#allocation17], 768  }
  0xbf   :  { %2692 = vsyncadd [#allocation17], 4294966528  ;;  %v2737_v0 = vmov 0   ;;  %vm319_vm0 = vcmask 1041408   ;;  %v289_v1 = vld [vmem:[%s2760_s5] sm:$0xff]  ;;  %v308_v3 = vld [vmem:[%s2780_s21 + $0x28] sm:$0xff]  ;;  %v287_v10 = vlaneseq }
  0xc0   :  { %2258 = vset.pattern.permute.xlu0 %v2737_v0  ;;  %v309_v2 = vld [vmem:[%s2780_s21 + $0x30] sm:$0x3]  ;;  %v307_v4 = vld [vmem:[%s2780_s21 + $0x20] sm:$0xff]  ;;  %v306_v5 = vld [vmem:[%s2780_s21 + $0x18] sm:$0xff]  ;;  %vm312_vm1 = vcmask 408576   ;;  %v2738_v13 = vmov 0.0  }
  0xc1   :  { %292 = vperm.xlu0 %2258, %v289_v1   ;;  %2107 = vmatpush.msk.msra.mxu0 %vm319_vm0, %v309_v2  ;;  %v290_v6 = vld [vmem:[%s2760_s5 + $0x8] sm:$0xff]  ;;  %v305_v7 = vld [vmem:[%s2780_s21 + $0x10] sm:$0xff]  ;;  %v303_v9 = vld [vmem:[%s2780_s21] sm:$0xff]  ;;  %v288_v11 = vand.u32 127, %v287_v10  ;;  %vm348_vm4 = vcmask 261120   ;;  %v2739_v25 = vmov 32.0  }
  0xc2   :  { %v304_v8 = vld [vmem:[%s2780_s21 + $0x8] sm:$0xff]  ;;  %v310_v17 = vld [vmem:[#allocation2] sm:$0xff]  ;;  %2321 = vrcp.f32 %v2739_v25  ;;  %v423_v42 = vld [vmem:[%s2795_s3 + $0x18] sm:$0xff]  ;;  %s3397_s5 = sld [smem:[#allocation27_spill]]  ;;  %s2740_s19 = smov 96   ;;  %vm463_vm12 = vcmask 64512  }
  0xc3   :  { %333 = vmatpush.msra.mxu0 %v308_v3  ;;  %v311_v21 = vld [vmem:[#allocation2 + $0x8] sm:$0xff]  ;;  %446 = vmatpush.msra.mxu1 %v423_v42  ;;  %v422_v43 = vld [vmem:[%s2795_s3 + $0x10] sm:$0xff]  ;;  %v420_v45 = vld [vmem:[%s2795_s3] sm:$0xff]  ;;  %s3398_s21 = sld [smem:[#allocation25_spill]]  ;;  %vm499_vm13 = vcmask 130048   ;;  %s2741_s25 = smov 64  }
  0xc4   :  { %v421_v44 = vld [vmem:[%s2795_s3 + $0x8] sm:$0xff]  ;;  %v2299_v60 = vld [vmem:[#allocation4] ss:$0 sm:$0xff]  ;;  %v2300_v0 = vld [vmem:[#allocation6] ss:$0 sm:$0xff]  ;;  %s3399_s27 = sld [smem:[#allocation26_spill]] }
  0xc5   :  { %334 = vmatpush.msra.mxu0 %v307_v4  ;;  %447 = vmatpush.msra.mxu1 %v422_v43  ;;  %s2742_s23 = smov 120   ;;  %s2743_s29 = smov 88   ;;  %vm885_vm14 = vcmask 195584  }
  0xc6   :  { %s2744_s26 = smov 80   ;;  %s2745_s30 = smov 112  }
  0xc7   :  { %335 = vmatpush.msra.mxu0 %v306_v5  ;;  %448 = vmatpush.msra.mxu1 %v421_v44  ;;  %s2746_s20 = smov 72   ;;  %s2747_s1 = smov 104  }
  0xc8   :  { %v2322_v26 = vpop.eup %2321  ;;  %v2301_v10 = vld [vmem:[%s3397_s5] ss:$0 sm:$0xff]  ;;  %s2748_s24 = smov 56   ;;  %s2749_s10 = smov 40  }
  0xc9   :  { %295 = vperm.xlu0 %2258, %v290_v6   ;;  %336 = vmatpush.msra.mxu0 %v305_v7  ;;  %v356_v27 = vmul.f32 32.0, %v2322_v26  ;;  %vm360_vm5 = vweird.f32 %v2322_v26  ;;  %s2750_s18 = smov 48   ;;  %s2751_s28 = smov 24  }
  0xca   :  { %449 = vmatpush.msra.mxu1 %v420_v45  ;;  %v411_v25 = vld [vmem:[%s3399_s27 + $0x8] sm:$0xff]  ;;  %s3400_s11 = sld [smem:[#allocation28_spill]] }
  0xcb   :  { %337 = vmatpush.msra.mxu0 %v304_v8  ;;  %v357_v28 = vsub.f32 1.0, %v356_v27  ;;  %s3401_s15 = sld [smem:[#allocation30_spill]] }
  0xcc   :  { %s3402_s17 = sld [smem:[#allocation29_spill]] }
  0xcd   :  { %338 = vmatpush.msra.mxu0 %v303_v9  ;;  %v358_v29 = vmul.f32 %v2322_v26, %v357_v28  ;;  %s3403_s6 = sld [smem:[#allocation31_spill]] }
  0xce   :  { %s3404_s16 = sld [smem:[#allocation32_spill]] }
  0xcf   :  { %v359_v30 = vadd.f32 %v2322_v26, %v358_v29  ;;  %s3408_s7 = sld [smem:[#allocation36_spill]] }
  0xd1   :  { %v2992_v31 = vsel %vm360_vm5, %v2322_v26, %v359_v30 }
 0x133   :  { %v293_v12 = vpop.permute.xlu0 %292 }
 0x134   :  { %vm297_vm2 = vcmp.eq.s32.totalorder %v288_v11, %v293_v12 }
 0x135   :  { %v2105_v14 = vsel %vm297_vm2, 1.0, %v2738_v13 }
 0x136   :  { %2108 = vmatmul.msk.f32.vlgmr.msra.gmra.mxu0 %vm312_vm1, %v2105_v14 }
 0x13b   :  { %v296_v15 = vpop.permute.xlu0 %295 }
 0x13c   :  { %vm298_vm3 = vcmp.eq.s32.totalorder %v288_v11, %v296_v15 }
 0x13d   :  { %v2106_v16 = vsel %vm298_vm3, 1.0, %v2738_v13 }
 0x13e   :  { %2109 = vmatmul.msk.f32.gmra.mxu0 %vm312_vm1, %v2106_v16 }
 0x1b3   :  { %v340_v18 = vpop.f32.mrf.mxu0 }
 0x1b4   :  { %v341_v19 = vadd.f32 %v340_v18, %v310_v17  ;;  %v412_v17 = vld [vmem:[%s3398_s21] sm:$0x1] }
 0x1b5   :  { %v413_v18 = vsub.f32 1.0, %v412_v17 }
 0x1b6   :  { %v349_v20 = vsel %vm348_vm4, %v341_v19, 0.0 }
 0x1b7   :  { %350 = vadd.xlane.f32.xlu1 %v349_v20 }
 0x1bb   :  { %v343_v22 = vpop.f32.mrf.mxu0 }
 0x1bc   :  { %v344_v23 = vadd.f32 %v343_v22, %v311_v21  ;;  %v410_v21 = vld [vmem:[%s3399_s27] sm:$0xff] }
 0x1be   :  { %v352_v24 = vsel %vm348_vm4, %v344_v23, 0.0 }
 0x1bf   :  { %353 = vadd.xlane.f32.xlu1 %v352_v24 }
 0x22a   :  { %v351_v32 = vpop.xlane.xlu1 %350 }
 0x22b   :  { %v362_v33 = vmul.f32 %v2992_v31, %v351_v32 }
 0x22d   :  { %v364_v34 = vsub.f32 %v341_v19, %v362_v33  ;;  %v414_v19 = vmul.f32 -10000.0, %v413_v18 }
 0x22f   :  { %v366_v35 = vmul.f32 %v364_v34, %v364_v34  ;;  %v416_v20 = vperm.slane %v414_v19, 0 }
 0x231   :  { %v368_v36 = vsel %vm348_vm4, %v366_v35, 0.0  ;;  %v3031_v22 = vadd.f32 %v416_v20, %v410_v21  ;;  %v3036_v28 = vadd.f32 %v416_v20, %v411_v25 }
 0x232   :  { %369 = vadd.xlane.f32.xlu2 %v368_v36  ;;  %v354_v37 = vpop.xlane.xlu1 %353 }
 0x233   :  { %v363_v38 = vmul.f32 %v2992_v31, %v354_v37 }
 0x235   :  { %v365_v39 = vsub.f32 %v344_v23, %v363_v38 }
 0x237   :  { %v367_v40 = vmul.f32 %v365_v39, %v365_v39 }
 0x239   :  { %v371_v41 = vsel %vm348_vm4, %v367_v40, 0.0 }
 0x23a   :  { %372 = vadd.xlane.f32.xlu2 %v371_v41 }
 0x2a5   :  { %v370_v46 = vpop.xlane.xlu2 %369 }
 0x2a6   :  { %v374_v47 = vmul.f32 %v370_v46, %v2992_v31 }
 0x2a8   :  { %v376_v48 = vadd.f32 1e-12, %v374_v47 }
 0x2aa   :  { %2323 = vrsqrt.f32 %v376_v48  ;;  %vm384_vm7 = vweird.f32 %v376_v48 }
 0x2ad   :  { %v373_v49 = vpop.xlane.xlu2 %372 }
 0x2ae   :  { %v375_v50 = vmul.f32 %v373_v49, %v2992_v31 }
 0x2b0   :  { %v2324_v51 = vpop.eup %2323  ;;  %v377_v52 = vadd.f32 1e-12, %v375_v50 }
 0x2b1   :  { %v379_v53 = vmul.f32 %v2324_v51, %v376_v48  ;;  %vm385_vm6 = vweird.f32 %v2324_v51 }
 0x2b2   :  { %2325 = vrsqrt.f32 %v377_v52  ;;  %vm386_vm8 = vmor %vm384_vm7, %vm385_vm6  ;;  %vm394_vm10 = vweird.f32 %v377_v52  ;;  %vm1050_vm7 = vcmask 523264  }
 0x2b3   :  { %v380_v54 = vmul.f32 %v2324_v51, %v379_v53 }
 0x2b5   :  { %v381_v55 = vmul.f32 0.5, %v380_v54 }
 0x2b7   :  { %v382_v56 = vsub.f32 1.5, %v381_v55 }
 0x2b8   :  { %v2326_v57 = vpop.eup %2325 }
 0x2b9   :  { %v383_v58 = vmul.f32 %v2324_v51, %v382_v56  ;;  %v389_v59 = vmul.f32 %v2326_v57, %v377_v52  ;;  %vm395_vm9 = vweird.f32 %v2326_v57 }
 0x2ba   :  { %vm396_vm11 = vmor %vm394_vm10, %vm395_vm9 }
 0x2bb   :  { %v387_v61 = vsel %vm386_vm8, %v2324_v51, %v383_v58  ;;  %v390_v62 = vmul.f32 %v2326_v57, %v389_v59 }
 0x2bc   :  { %v398_v63 = vmul.f32 %v387_v61, %v364_v34 }
 0x2bd   :  { %v391_v1 = vmul.f32 0.5, %v390_v62 }
 0x2be   :  { %v403_v2 = vmul.f32 %v2299_v60, %v398_v63 }
 0x2bf   :  { %v392_v3 = vsub.f32 1.5, %v391_v1 }
 0x2c0   :  { %v3004_v4 = vadd.f32 %v2300_v0, %v403_v2 }
 0x2c1   :  { %v393_v5 = vmul.f32 %v2326_v57, %v392_v3 }
 0x2c2   :  { %2110 = vmatmul.msk.f32.vlgmr.msra.gmra.mxu1 %vm348_vm4, %v3004_v4 }
 0x2c3   :  { %v397_v6 = vsel %vm396_vm11, %v2326_v57, %v393_v5 }
 0x2c4   :  { %v399_v7 = vmul.f32 %v397_v6, %v365_v39 }
 0x2c6   :  { %v404_v8 = vmul.f32 %v2299_v60, %v399_v7 }
 0x2c8   :  { %v3008_v9 = vadd.f32 %v2300_v0, %v404_v8 }
 0x2ca   :  { %2111 = vmatmul.msk.f32.gmra.mxu1 %vm348_vm4, %v3008_v9 }
 0x33f   :  { %v451_v11 = vpop.f32.mrf.mxu1 }
 0x340   :  { %v3013_v12 = vadd.f32 %v2301_v10, %v451_v11 }
 0x342   :  { %459 = vrot.lane.b32.xlu1 %v3013_v12, %s2740_s19 }
 0x347   :  { %v454_v13 = vpop.f32.mrf.mxu1 }
 0x348   :  { %v3017_v14 = vadd.f32 %v2301_v10, %v454_v13 }
 0x34a   :  { %461 = vrot.lane.b32.xlu0 %v3017_v14, %s2740_s19  ;;  %v3042_v34 = vpack.i.bf16 %v3013_v12, %v3017_v14 }
 0x3b4   :  { %v460_v16 = vpop.permute.xlu1 %459 }
 0x3bc   :  { %v462_v15 = vpop.permute.xlu0 %461 }
 0x3bd   :  { %2112 = vmatpush.xpose.msk.msrb.mxu0 %vm463_vm12, %v462_v15  ;;  %2197 = vmatpush.xpose.msk.msra.mxu2 %vm463_vm12, %v462_v15 }
 0x3c1   :  { %2113 = vmatpush.xpose.msk.msrb.mxu0 %vm463_vm12, %v460_v16  ;;  %2198 = vmatpush.xpose.msk.msra.mxu2 %vm463_vm12, %v460_v16 }
 0x3c4   :  { %2114 = vmatmul.msk.f32.vlgmr.msrb.gmra.mxu0 %vm463_vm12, %v3013_v12  ;;  %2115 = vmatmul.msk.f32.vlgmr.msra.gmra.mxu2 %vm463_vm12, %v3017_v14 }
 0x441   :  { %v489_v23 = vpop.f32.mrf.mxu0 }
 0x442   :  { %v495_v24 = vmul.f32 0.35355338, %v489_v23 }
 0x444   :  { %v497_v26 = vadd.f32 %v495_v24, %v3031_v22 }
 0x446   :  { %v500_v27 = vsel %vm499_vm13, %v497_v26, -inf }
 0x447   :  { %v492_v29 = vpop.f32.mrf.mxu2  ;;  %501 = vmax.xlane.f32.xlu2 %v500_v27 }
 0x448   :  { %v496_v30 = vmul.f32 0.35355338, %v492_v29 }
 0x44a   :  { %v498_v32 = vadd.f32 %v496_v30, %v3036_v28 }
 0x44c   :  { %v503_v33 = vsel %vm499_vm13, %v498_v32, -inf }
 0x44d   :  { %504 = vmax.xlane.f32.xlu0 %v503_v33 }
 0x45f   :  { %2260 = vrot.lane.b32.xlu2 %v3042_v34, %s2741_s25 }
 0x461   :  { %557 = vrot.lane.b32.xlu0 %v3013_v12, %s2742_s23 }
 0x467   :  { %563 = vrot.lane.b32.xlu2 %v3017_v14, %s2743_s29 }
 0x469   :  { %661 = vrot.lane.b32.xlu0 %v3013_v12, %s2744_s26 }
 0x46f   :  { %561 = vrot.lane.b32.xlu2 %v3013_v12, %s2743_s29 }
 0x471   :  { %657 = vrot.lane.b32.xlu0 %v3013_v12, %s2745_s30 }
 0x477   :  { %559 = vrot.lane.b32.xlu2 %v3017_v14, %s2742_s23 }
 0x479   :  { %659 = vrot.lane.b32.xlu0 %v3017_v14, %s2745_s30 }
 0x47f   :  { %663 = vrot.lane.b32.xlu2 %v3017_v14, %s2744_s26 }
 0x4ba   :  { %v502_v35 = vpop.xlane.xlu2 %501 }
 0x4bb   :  { %v506_v36 = vsub.f32 %v497_v26, %v502_v35 }
 0x4bd   :  { %v508_v37 = vmul.f32 1.442695, %v506_v36 }
 0x4bf   :  { %2327 = vpow2.f32 %v508_v37 }
 0x4c0   :  { %v505_v38 = vpop.xlane.xlu0 %504 }
 0x4c1   :  { %v507_v39 = vsub.f32 %v498_v32, %v505_v38 }
 0x4c2   :  { %v2261_v40 = vpop.permute.xlu2 %2260 }
 0x4c3   :  { %v510_v41 = vmul.f32 1.442695, %v507_v39  ;;  %v2262_v42 = vunpack.i.l.bf16 %v2261_v40  ;;  %v2263_v44 = vunpack.i.h.bf16 %v2261_v40 }
 0x4c5   :  { %v2328_v43 = vpop.eup %2327  ;;  %2329 = vpow2.f32 %v510_v41  ;;  %548 = vmatpush.msra.mxu3 %v2262_v42 }
 0x4c6   :  { %v512_v45 = vsel %vm499_vm13, %v2328_v43, 0.0 }
 0x4c7   :  { %513 = vadd.xlane.f32.xlu2 %v512_v45  ;;  %549 = vmatpush.msra.mxu3 %v2263_v44 }
 0x4ca   :  { %v564_v46 = vpop.permute.xlu2 %563 }
 0x4cb   :  { %v2330_v47 = vpop.eup %2329  ;;  %2118 = vmatpush.xpose.msk.msrb.mxu3 %vm463_vm12, %v564_v46 }
 0x4cc   :  { %v515_v48 = vsel %vm499_vm13, %v2330_v47, 0.0 }
 0x4cd   :  { %516 = vadd.xlane.f32.xlu1 %v515_v48 }
 0x4d2   :  { %v562_v49 = vpop.permute.xlu2 %561 }
 0x4d3   :  { %v558_v50 = vpop.permute.xlu0 %557  ;;  %2119 = vmatpush.xpose.msk.msrb.mxu3 %vm463_vm12, %v562_v49 }
 0x4da   :  { %v560_v51 = vpop.permute.xlu2 %559 }
 0x4db   :  { %v662_v52 = vpop.permute.xlu0 %661 }
 0x4df   :  { %761 = vrot.lane.b32.xlu2 %v3013_v12, %s2746_s20 }
 0x4e2   :  { %v664_v53 = vpop.permute.xlu2 %663 }
 0x4e3   :  { %2124 = vmatpush.xpose.msk.msrb.mxu2 %vm463_vm12, %v664_v53  ;;  %v658_v54 = vpop.permute.xlu0 %657 }
 0x4e6   :  { %763 = vrot.lane.b32.xlu1 %v3017_v14, %s2746_s20 }
 0x4e7   :  { %757 = vrot.lane.b32.xlu2 %v3013_v12, %s2747_s1  ;;  %2125 = vmatpush.xpose.msk.msrb.mxu2 %vm463_vm12, %v662_v52 }
 0x4ea   :  { %2126 = vmatmul.msk.f32.vlgmr.msrb.gmra.mxu2 %vm463_vm12, %v658_v54 }
 0x4eb   :  { %v660_v55 = vpop.permute.xlu0 %659 }
 0x4ef   :  { %759 = vrot.lane.b32.xlu2 %v3017_v14, %s2747_s1 }
 0x4f2   :  { %2127 = vmatmul.msk.f32.gmra.mxu2 %vm463_vm12, %v660_v55 }
 0x53a   :  { %v514_v56 = vpop.xlane.xlu2 %513 }
 0x53b   :  { %2331 = vrcp.f32 %v514_v56 }
 0x540   :  { %v517_v57 = vpop.xlane.xlu1 %516 }
 0x541   :  { %v2332_v58 = vpop.eup %2331  ;;  %2333 = vrcp.f32 %v517_v57 }
 0x542   :  { %v520_v59 = vmul.f32 %v2332_v58, %v2328_v43  ;;  %v762_v62 = vpop.permute.xlu2 %761 }
 0x544   :  { %2116 = vmatmul.msk.f32.vlgmr.msra.gmra.mxu3 %vm499_vm13, %v520_v59 }
 0x547   :  { %v2334_v60 = vpop.eup %2333 }
 0x548   :  { %v521_v61 = vmul.f32 %v2334_v60, %v2330_v47 }
 0x54a   :  { %v758_v0 = vpop.permute.xlu2 %757 }
 0x54c   :  { %2117 = vmatmul.msk.f32.gmra.mxu3 %vm499_vm13, %v521_v61 }
 0x552   :  { %v760_v1 = vpop.permute.xlu2 %759 }
 0x554   :  { %2120 = vmatmul.msk.f32.vlgmr.msrb.gmra.mxu3 %vm463_vm12, %v558_v50 }
 0x558   :  { %v764_v63 = vpop.permute.xlu1 %763 }
 0x559   :  { %2130 = vmatpush.xpose.msk.msra.mxu3 %vm463_vm12, %v764_v63 }
 0x55c   :  { %2121 = vmatmul.msk.f32.gmra.mxu3 %vm463_vm12, %v560_v51 }
 0x55d   :  { %2131 = vmatpush.xpose.msk.msra.mxu3 %vm463_vm12, %v762_v62 }
 0x564   :  { %2132 = vmatmul.msk.f32.vlgmr.msra.gmra.mxu3 %vm463_vm12, %v758_v0 }
 0x56c   :  { %2133 = vmatmul.msk.f32.gmra.mxu3 %vm463_vm12, %v760_v1 }
 0x56d   :  { %v690_v2 = vpop.f32.mrf.mxu2 }
 0x56e   :  { %v696_v3 = vmul.f32 0.35355338, %v690_v2 }
 0x570   :  { %v698_v5 = vadd.f32 %v696_v3, %v3031_v22 }
 0x572   :  { %v700_v6 = vsel %vm499_vm13, %v698_v5, -inf }
 0x573   :  { %701 = vmax.xlane.f32.xlu2 %v700_v6 }
 0x575   :  { %v693_v16 = vpop.f32.mrf.mxu2 }
 0x576   :  { %v697_v18 = vmul.f32 0.35355338, %v693_v16 }
 0x578   :  { %v699_v25 = vadd.f32 %v697_v18, %v3036_v28 }
 0x57a   :  { %v703_v30 = vsel %vm499_vm13, %v699_v25, -inf }
 0x5c7   :  { %v3088_v7 = vpop.f32.mrf.mxu3 }
 0x5cf   :  { %v3090_v8 = vpop.f32.mrf.mxu3 }
 0x5d7   :  { %v590_v10 = vpop.f32.mrf.mxu3 }
 0x5d8   :  { %v596_v11 = vmul.f32 0.35355338, %v590_v10 }
 0x5da   :  { %v598_v12 = vadd.f32 %v596_v11, %v3031_v22 }
 0x5dc   :  { %v600_v13 = vsel %vm499_vm13, %v598_v12, -inf }
 0x5dd   :  { %601 = vmax.xlane.f32.xlu1 %v600_v13 }
 0x5df   :  { %v593_v14 = vpop.f32.mrf.mxu3 }
 0x5e0   :  { %v597_v15 = vmul.f32 0.35355338, %v593_v14 }
 0x5e2   :  { %v599_v17 = vadd.f32 %v597_v15, %v3036_v28 }
 0x5e4   :  { %v603_v19 = vsel %vm499_vm13, %v599_v17, -inf }
 0x5e5   :  { %604 = vmax.xlane.f32.xlu0 %v603_v19 }
 0x5e6   :  { %v702_v20 = vpop.xlane.xlu2 %701 }
 0x5e7   :  { %v706_v21 = vsub.f32 %v698_v5, %v702_v20  ;;  %v790_v23 = vpop.f32.mrf.mxu3 }
 0x5e8   :  { %v796_v24 = vmul.f32 0.35355338, %v790_v23 }
 0x5e9   :  { %v708_v26 = vmul.f32 1.442695, %v706_v21 }
 0x5ea   :  { %v798_v27 = vadd.f32 %v796_v24, %v3031_v22 }
 0x5eb   :  { %2335 = vpow2.f32 %v708_v26 }
 0x5ec   :  { %v800_v29 = vsel %vm499_vm13, %v798_v27, -inf }
 0x5ed   :  { %801 = vmax.xlane.f32.xlu1 %v800_v29  ;;  %704 = vmax.xlane.f32.xlu0 %v703_v30 }
 0x5ef   :  { %v793_v32 = vpop.f32.mrf.mxu3 }
 0x5f0   :  { %v797_v33 = vmul.f32 0.35355338, %v793_v32 }
 0x5f1   :  { %v3100_v35 = vpop.eup %2335 }
 0x5f2   :  { %v799_v36 = vadd.f32 %v797_v33, %v3036_v28  ;;  %v712_v37 = vsel %vm499_vm13, %v3100_v35, 0.0 }
 0x5f4   :  { %v803_v38 = vsel %vm499_vm13, %v799_v36, -inf }
 0x5f5   :  { %713 = vadd.xlane.f32.xlu1 %v712_v37  ;;  %804 = vmax.xlane.f32.xlu2 %v803_v38 }
 0x601   :  { %2265 = vrot.lane.b32.xlu0 %v3042_v34, %s2748_s24 }
 0x609   :  { %2275 = vrot.lane.b32.xlu0 %v3042_v34, %s2749_s10 }
 0x650   :  { %v602_v39 = vpop.xlane.xlu1 %601 }
 0x651   :  { %v606_v40 = vsub.f32 %v598_v12, %v602_v39 }
 0x653   :  { %v608_v41 = vmul.f32 1.442695, %v606_v40  ;;  %v891_v40 = vld [vmem:[#allocation7 + $0x18] sm:$0xff] }
 0x654   :  { %914 = vmatpush.msra.mxu2 %v891_v40 }
 0x655   :  { %2337 = vpow2.f32 %v608_v41  ;;  %v890_v41 = vld [vmem:[#allocation7 + $0x10] sm:$0xff] }
 0x656   :  { %915 = vmatpush.msra.mxu2 %v890_v41 }
 0x658   :  { %v605_v42 = vpop.xlane.xlu0 %604 }
 0x659   :  { %v607_v48 = vsub.f32 %v599_v17, %v605_v42  ;;  %v889_v42 = vld [vmem:[#allocation7 + $0x8] sm:$0xff] }
 0x65a   :  { %916 = vmatpush.msra.mxu2 %v889_v42 }
 0x65b   :  { %v2338_v43 = vpop.eup %2337  ;;  %v610_v49 = vmul.f32 1.442695, %v607_v48 }
 0x65c   :  { %v612_v44 = vsel %vm499_vm13, %v2338_v43, 0.0 }
 0x65d   :  { %613 = vadd.xlane.f32.xlu1 %v612_v44 }
 0x660   :  { %v705_v45 = vpop.xlane.xlu0 %704  ;;  %v802_v50 = vpop.xlane.xlu1 %801 }
 0x661   :  { %v707_v46 = vsub.f32 %v699_v25, %v705_v45  ;;  %v806_v52 = vsub.f32 %v798_v27, %v802_v50 }
 0x663   :  { %v710_v47 = vmul.f32 1.442695, %v707_v46  ;;  %v808_v54 = vmul.f32 1.442695, %v806_v52 }
 0x665   :  { %2339 = vpow2.f32 %v710_v47 }
 0x666   :  { %2341 = vpow2.f32 %v610_v49 }
 0x667   :  { %2343 = vpow2.f32 %v808_v54 }
 0x668   :  { %v805_v55 = vpop.xlane.xlu2 %804  ;;  %v714_v10 = vpop.xlane.xlu1 %713 }
 0x669   :  { %v807_v58 = vsub.f32 %v799_v36, %v805_v55 }
 0x66b   :  { %v2340_v51 = vpop.eup %2339  ;;  %v810_v62 = vmul.f32 1.442695, %v807_v58 }
 0x66c   :  { %v715_v53 = vsel %vm499_vm13, %v2340_v51, 0.0  ;;  %v2342_v56 = vpop.eup %2341 }
 0x66d   :  { %716 = vadd.xlane.f32.xlu2 %v715_v53  ;;  %v615_v60 = vsel %vm499_vm13, %v2342_v56, 0.0  ;;  %v2344_v63 = vpop.eup %2343  ;;  %2345 = vpow2.f32 %v810_v62 }
 0x66e   :  { %v812_v2 = vsel %vm499_vm13, %v2344_v63, 0.0 }
 0x673   :  { %v2266_v57 = vpop.permute.xlu0 %2265  ;;  %v2346_v5 = vpop.eup %2345 }
 0x674   :  { %v2267_v59 = vunpack.i.l.bf16 %v2266_v57  ;;  %v2268_v61 = vunpack.i.h.bf16 %v2266_v57  ;;  %v815_v6 = vsel %vm499_vm13, %v2346_v5, 0.0 }
 0x675   :  { %616 = vadd.xlane.f32.xlu2 %v615_v60 }
 0x676   :  { %2270 = vrot.lane.b32.xlu1 %v3042_v34, %s2750_s18  ;;  %648 = vmatpush.msrb.mxu1 %v2267_v59 }
 0x678   :  { %649 = vmatpush.msrb.mxu1 %v2268_v61 }
 0x67b   :  { %v2276_v0 = vpop.permute.xlu0 %2275 }
 0x67c   :  { %v2277_v1 = vunpack.i.l.bf16 %v2276_v0  ;;  %v2278_v3 = vunpack.i.h.bf16 %v2276_v0 }
 0x67d   :  { %813 = vadd.xlane.f32.xlu2 %v812_v2 }
 0x67e   :  { %848 = vmatpush.msra.mxu1 %v2277_v1 }
 0x680   :  { %849 = vmatpush.msra.mxu1 %v2278_v3 }
 0x685   :  { %816 = vadd.xlane.f32.xlu2 %v815_v6 }
 0x6d0   :  { %v614_v34 = vpop.xlane.xlu1 %613 }
 0x6d1   :  { %2347 = vrcp.f32 %v614_v34 }
 0x6d2   :  { %2349 = vrcp.f32 %v714_v10 }
 0x6d7   :  { %v2348_v11 = vpop.eup %2347 }
 0x6d8   :  { %v620_v12 = vmul.f32 %v2348_v11, %v2338_v43  ;;  %v2350_v15 = vpop.eup %2349  ;;  %v888_v43 = vld [vmem:[#allocation7] sm:$0xff]  ;;  %v985_v11 = vld [vmem:[#allocation12 + $0x10] sm:$0xff] }
 0x6d9   :  { %v720_v19 = vmul.f32 %v2350_v15, %v3100_v35  ;;  %917 = vmatpush.msra.mxu2 %v888_v43 }
 0x6da   :  { %2122 = vmatmul.msk.f32.vlgmr.msrb.gmra.mxu1 %vm499_vm13, %v620_v12  ;;  %v984_v12 = vld [vmem:[#allocation12 + $0x8] sm:$0xff] }
 0x6e0   :  { %v717_v13 = vpop.xlane.xlu2 %716 }
 0x6e8   :  { %v2271_v14 = vpop.permute.xlu1 %2270  ;;  %v617_v17 = vpop.xlane.xlu2 %616 }
 0x6e9   :  { %v2272_v16 = vunpack.i.l.bf16 %v2271_v14  ;;  %2351 = vrcp.f32 %v617_v17  ;;  %v2273_v18 = vunpack.i.h.bf16 %v2271_v14 }
 0x6ea   :  { %2353 = vrcp.f32 %v717_v13  ;;  %v983_v13 = vld [vmem:[#allocation12] sm:$0xff] }
 0x6eb   :  { %748 = vmatpush.msra.mxu0 %v2272_v16 }
 0x6ed   :  { %749 = vmatpush.msra.mxu0 %v2273_v18 }
 0x6ee   :  { %2128 = vmatmul.msk.f32.vlgmr.msra.gmra.mxu0 %vm499_vm13, %v720_v19 }
 0x6ef   :  { %v2352_v20 = vpop.eup %2351 }
 0x6f0   :  { %v2354_v21 = vpop.eup %2353  ;;  %v814_v23 = vpop.xlane.xlu2 %813  ;;  %v621_v24 = vmul.f32 %v2352_v20, %v2342_v56 }
 0x6f1   :  { %2355 = vrcp.f32 %v814_v23  ;;  %v721_v25 = vmul.f32 %v2354_v21, %v2340_v51 }
 0x6f2   :  { %2123 = vmatmul.msk.f32.gmra.mxu1 %vm499_vm13, %v621_v24 }
 0x6f6   :  { %2129 = vmatmul.msk.f32.gmra.mxu0 %vm499_vm13, %v721_v25 }
 0x6f7   :  { %v2356_v26 = vpop.eup %2355 }
 0x6f8   :  { %v820_v27 = vmul.f32 %v2356_v26, %v2344_v63  ;;  %v817_v29 = vpop.xlane.xlu2 %816 }
 0x6f9   :  { %2357 = vrcp.f32 %v817_v29  ;;  %v2303_v29 = vld [vmem:[#allocation9] ss:$0 sm:$0xff] }
 0x6fa   :  { %2134 = vmatmul.msk.f32.vlgmr.msra.gmra.mxu1 %vm499_vm13, %v820_v27 }
 0x6ff   :  { %v2358_v30 = vpop.eup %2357 }
 0x700   :  { %v821_v32 = vmul.f32 %v2358_v30, %v2346_v5 }
 0x702   :  { %2135 = vmatmul.msk.f32.gmra.mxu1 %vm499_vm13, %v821_v32 }
 0x757   :  { %v651_v33 = vpop.f32.mrf.mxu1 }
 0x758   :  { %859 = vrot.lane.b32.xlu0 %v651_v33, %s2725_s2 }
 0x76b   :  { %v751_v35 = vpop.f32.mrf.mxu0 }
 0x76c   :  { %867 = vrot.lane.b32.xlu2 %v751_v35, %s2727_s22 }
 0x76f   :  { %v654_v36 = vpop.f32.mrf.mxu1 }
 0x770   :  { %861 = vrot.lane.b32.xlu1 %v654_v36, %s2725_s2  ;;  %v2304_v36 = vld [vmem:[#allocation10] ss:$0 sm:$0xff] }
 0x773   :  { %v754_v38 = vpop.f32.mrf.mxu0 }
 0x777   :  { %v851_v37 = vpop.f32.mrf.mxu1 }
 0x778   :  { %875 = vrot.lane.b32.xlu0 %v851_v37, %s2751_s28 }
 0x77f   :  { %v854_v39 = vpop.f32.mrf.mxu1 }
 0x780   :  { %869 = vrot.lane.b32.xlu0 %v754_v38, %s2727_s22  ;;  %877 = vrot.lane.b32.xlu1 %v854_v39, %s2751_s28 }
 0x7c6   :  { %v868_v46 = vpop.permute.xlu2 %867 }
 0x7ca   :  { %v860_v44 = vpop.permute.xlu0 %859 }
 0x7cb   :  { %v881_v45 = vsel %vm463_vm12, %v3088_v7, %v860_v44  ;;  %v2302_v7 = vld [vmem:[%s3400_s11] ss:$0 sm:$0xff] }
 0x7cc   :  { %v883_v48 = vsel %vm499_vm13, %v881_v45, %v868_v46  ;;  %v1045_v46 = vld [vmem:[%s3401_s15 + $0x38] sm:$0xff] }
 0x7cd   :  { %1065 = vmatpush.msrb.mxu3 %v1045_v46 }
 0x7e2   :  { %v862_v47 = vpop.permute.xlu1 %861 }
 0x7e3   :  { %v882_v51 = vsel %vm463_vm12, %v3090_v8, %v862_v47  ;;  %v1044_v47 = vld [vmem:[%s3401_s15 + $0x30] sm:$0xff] }
 0x7e4   :  { %1066 = vmatpush.msrb.mxu3 %v1044_v47 }
 0x7ea   :  { %v876_v49 = vpop.permute.xlu0 %875 }
 0x7eb   :  { %v886_v50 = vsel %vm885_vm14, %v883_v48, %v876_v49  ;;  %v1043_v48 = vld [vmem:[%s3401_s15 + $0x28] sm:$0xff]  ;;  %v1042_v49 = vld [vmem:[%s3401_s15 + $0x20] sm:$0xff] }
 0x7ec   :  { %2136 = vmatmul.msk.f32.vlgmr.msra.gmra.mxu2 %vm348_vm4, %v886_v50  ;;  %1067 = vmatpush.msrb.mxu3 %v1043_v48  ;;  %v1041_v50 = vld [vmem:[%s3401_s15 + $0x18] sm:$0xff] }
 0x7ee   :  { %1068 = vmatpush.msrb.mxu3 %v1042_v49 }
 0x7f0   :  { %1069 = vmatpush.msrb.mxu3 %v1041_v50 }
 0x7f2   :  { %v870_v52 = vpop.permute.xlu0 %869  ;;  %v878_v53 = vpop.permute.xlu1 %877 }
 0x7f3   :  { %v884_v54 = vsel %vm499_vm13, %v882_v51, %v870_v52  ;;  %v1040_v51 = vld [vmem:[%s3401_s15 + $0x10] sm:$0xff]  ;;  %v1039_v52 = vld [vmem:[%s3401_s15 + $0x8] sm:$0xff] }
 0x7f4   :  { %v887_v55 = vsel %vm885_vm14, %v884_v54, %v878_v53  ;;  %1070 = vmatpush.msrb.mxu3 %v1040_v51  ;;  %v1038_v53 = vld [vmem:[%s3401_s15] sm:$0xff] }
 0x7f5   :  { %2137 = vmatmul.msk.f32.gmra.mxu2 %vm348_vm4, %v887_v55  ;;  %v2305_v54 = vld [vmem:[%s3402_s17] ss:$0 sm:$0xff] }
 0x7f6   :  { %1071 = vmatpush.msrb.mxu3 %v1039_v52  ;;  %v2307_v52 = vld [vmem:[#allocation13] ss:$0 sm:$0xff] }
 0x7f8   :  { %1072 = vmatpush.msrb.mxu3 %v1038_v53 }
 0x86f   :  { %v919_v56 = vpop.f32.mrf.mxu2 }
 0x870   :  { %v920_v57 = vadd.f32 %v2302_v7, %v919_v56 }
 0x872   :  { %v925_v58 = vadd.f32 %v920_v57, %v3004_v4 }
 0x874   :  { %v929_v59 = vsel %vm348_vm4, %v925_v58, 0.0 }
 0x875   :  { %930 = vadd.xlane.f32.xlu0 %v929_v59 }
 0x878   :  { %v922_v60 = vpop.f32.mrf.mxu2 }
 0x879   :  { %v923_v61 = vadd.f32 %v2302_v7, %v922_v60 }
 0x87b   :  { %v926_v8 = vadd.f32 %v923_v61, %v3008_v9  ;;  %v986_v9 = vld [vmem:[#allocation12 + $0x18] sm:$0xff] }
 0x87c   :  { %1009 = vmatpush.msrb.mxu0 %v986_v9 }
 0x87d   :  { %v932_v62 = vsel %vm348_vm4, %v926_v8, 0.0 }
 0x87e   :  { %933 = vadd.xlane.f32.xlu1 %v932_v62  ;;  %1010 = vmatpush.msrb.mxu0 %v985_v11 }
 0x880   :  { %1011 = vmatpush.msrb.mxu0 %v984_v12  ;;  %v2306_v12 = vld [vmem:[%s3403_s6] ss:$0 sm:$0xff] }
 0x882   :  { %1012 = vmatpush.msrb.mxu0 %v983_v13 }
 0x8e8   :  { %v931_v63 = vpop.xlane.xlu0 %930 }
 0x8e9   :  { %v935_v0 = vmul.f32 %v931_v63, %v2992_v31 }
 0x8eb   :  { %v937_v1 = vsub.f32 %v925_v58, %v935_v0 }
 0x8ed   :  { %v939_v2 = vmul.f32 %v937_v1, %v937_v1 }
 0x8ef   :  { %v941_v3 = vsel %vm348_vm4, %v939_v2, 0.0 }
 0x8f0   :  { %942 = vadd.xlane.f32.xlu2 %v941_v3 }
 0x8f1   :  { %v934_v5 = vpop.xlane.xlu1 %933 }
 0x8f2   :  { %v936_v4 = vmul.f32 %v934_v5, %v2992_v31 }
 0x8f4   :  { %v938_v6 = vsub.f32 %v926_v8, %v936_v4 }
 0x8f6   :  { %v940_v10 = vmul.f32 %v938_v6, %v938_v6 }
 0x8f8   :  { %v944_v34 = vsel %vm348_vm4, %v940_v10, 0.0 }
 0x8f9   :  { %945 = vadd.xlane.f32.xlu0 %v944_v34 }
 0x963   :  { %v943_v14 = vpop.xlane.xlu2 %942 }
 0x964   :  { %v947_v15 = vmul.f32 %v943_v14, %v2992_v31 }
 0x966   :  { %v949_v16 = vadd.f32 1e-12, %v947_v15 }
 0x968   :  { %2359 = vrsqrt.f32 %v949_v16  ;;  %vm957_vm1 = vweird.f32 %v949_v16 }
 0x96c   :  { %v946_v17 = vpop.xlane.xlu0 %945 }
 0x96d   :  { %v948_v18 = vmul.f32 %v946_v17, %v2992_v31 }
 0x96e   :  { %v2360_v19 = vpop.eup %2359 }
 0x96f   :  { %v952_v20 = vmul.f32 %v2360_v19, %v949_v16  ;;  %v950_v21 = vadd.f32 1e-12, %v948_v18  ;;  %vm958_vm15 = vweird.f32 %v2360_v19 }
 0x970   :  { %vm959_vm2 = vmor %vm957_vm1, %vm958_vm15 }
 0x971   :  { %v953_v23 = vmul.f32 %v2360_v19, %v952_v20  ;;  %2361 = vrsqrt.f32 %v950_v21  ;;  %vm967_vm5 = vweird.f32 %v950_v21 }
 0x973   :  { %v954_v24 = vmul.f32 0.5, %v953_v23 }
 0x975   :  { %v955_v25 = vsub.f32 1.5, %v954_v24 }
 0x977   :  { %v2362_v26 = vpop.eup %2361  ;;  %v956_v27 = vmul.f32 %v2360_v19, %v955_v25 }
 0x978   :  { %v962_v30 = vmul.f32 %v2362_v26, %v950_v21  ;;  %vm968_vm3 = vweird.f32 %v2362_v26 }
 0x979   :  { %v960_v32 = vsel %vm959_vm2, %v2360_v19, %v956_v27  ;;  %vm969_vm6 = vmor %vm967_vm5, %vm968_vm3 }
 0x97a   :  { %v971_v33 = vmul.f32 %v960_v32, %v937_v1  ;;  %v963_v35 = vmul.f32 %v2362_v26, %v962_v30 }
 0x97c   :  { %v976_v37 = vmul.f32 %v2303_v29, %v971_v33  ;;  %v964_v38 = vmul.f32 0.5, %v963_v35  ;;  %v2145_v35 = vld [vmem:[%s2795_s3 + $0x38] sm:$0xff] }
 0x97d   :  { %1166 = vmatpush.msrb.mxu1 %v2145_v35 }
 0x97e   :  { %v965_v39 = vsub.f32 1.5, %v964_v38  ;;  %v981_v40 = vadd.f32 %v2304_v36, %v976_v37  ;;  %v2143_v37 = vld [vmem:[%s2795_s3 + $0x28] sm:$0xff]  ;;  %v2142_v38 = vld [vmem:[%s2795_s3 + $0x20] sm:$0xff] }
 0x980   :  { %v966_v41 = vmul.f32 %v2362_v26, %v965_v39  ;;  %2138 = vmatmul.msk.f32.vlgmr.msrb.gmra.mxu0 %vm348_vm4, %v981_v40 }
 0x982   :  { %v970_v42 = vsel %vm969_vm6, %v2362_v26, %v966_v41 }
 0x983   :  { %v972_v43 = vmul.f32 %v970_v42, %v938_v6 }
 0x985   :  { %v977_v44 = vmul.f32 %v2303_v29, %v972_v43 }
 0x987   :  { %v982_v45 = vadd.f32 %v2304_v36, %v977_v44  ;;  %v2144_v36 = vld [vmem:[%s2795_s3 + $0x30] sm:$0xff]  ;;  %s3405_s3 = sld [smem:[#allocation33_spill]] }
 0x988   :  { %1167 = vmatpush.msrb.mxu1 %v2144_v36 }
 0x989   :  { %2139 = vmatmul.msk.f32.gmra.mxu0 %vm348_vm4, %v982_v45 }
 0x98a   :  { %1168 = vmatpush.msrb.mxu1 %v2143_v37 }
 0x98c   :  { %1169 = vmatpush.msrb.mxu1 %v2142_v38 }
 0x9fd   :  { %v1014_v55 = vpop.f32.mrf.mxu0 }
 0x9fe   :  { %v1015_v7 = vadd.f32 %v2305_v54, %v1014_v55 }
 0xa00   :  { %v1022_v56 = vmul.f32 0.044715, %v1015_v7  ;;  %v1020_v3 = vmul.f32 0.5, %v1015_v7 }
 0xa02   :  { %v1024_v57 = vmul.f32 %v1022_v56, %v1015_v7  ;;  %v2308_v56 = vld [vmem:[%s3404_s16] ss:$0 sm:$0xff] }
 0xa04   :  { %v1026_v58 = vmul.f32 %v1024_v57, %v1015_v7 }
 0xa06   :  { %v1028_v59 = vadd.f32 %v1026_v58, %v1015_v7  ;;  %v1017_v60 = vpop.f32.mrf.mxu0 }
 0xa07   :  { %v1018_v61 = vadd.f32 %v2305_v54, %v1017_v60 }
 0xa08   :  { %v1030_v8 = vmul.f32 0.7978846, %v1028_v59 }
 0xa09   :  { %v1023_v62 = vmul.f32 0.044715, %v1018_v61  ;;  %v1021_v34 = vmul.f32 0.5, %v1018_v61 }
 0xa0a   :  { %2363 = vtanh.f32 %v1030_v8 }
 0xa0b   :  { %v1025_v63 = vmul.f32 %v1023_v62, %v1018_v61 }
 0xa0d   :  { %v1027_v0 = vmul.f32 %v1025_v63, %v1018_v61 }
 0xa0f   :  { %v1029_v1 = vadd.f32 %v1027_v0, %v1018_v61 }
 0xa10   :  { %v2364_v2 = vpop.eup %2363 }
 0xa11   :  { %v1034_v5 = vadd.f32 1.0, %v2364_v2  ;;  %v1031_v4 = vmul.f32 0.7978846, %v1029_v1  ;;  %v2309_v1 = vld [vmem:[%s3397_s5 + $0x1] ss:$0 sm:$0xff] }
 0xa13   :  { %v1036_v6 = vmul.f32 %v1034_v5, %v1020_v3  ;;  %2365 = vtanh.f32 %v1031_v4 }
 0xa15   :  { %2140 = vmatmul.msk.f32.vlgmr.msrb.gmra.mxu3 %vm1050_vm7, %v1036_v6 }
 0xa19   :  { %v2366_v10 = vpop.eup %2365 }
 0xa1a   :  { %v1035_v9 = vadd.f32 1.0, %v2366_v10 }
 0xa1c   :  { %v1037_v11 = vmul.f32 %v1035_v9, %v1021_v34 }
 0xa1e   :  { %2141 = vmatmul.msk.f32.gmra.mxu3 %vm1050_vm7, %v1037_v11 }
 0xa98   :  { %v1074_v13 = vpop.f32.mrf.mxu3 }
 0xa99   :  { %v1075_v14 = vadd.f32 %v2306_v12, %v1074_v13 }
 0xa9b   :  { %v1080_v15 = vadd.f32 %v1075_v14, %v981_v40 }
 0xa9d   :  { %v1084_v16 = vsel %vm348_vm4, %v1080_v15, 0.0 }
 0xa9e   :  { %1085 = vadd.xlane.f32.xlu1 %v1084_v16 }
 0xaa1   :  { %v1077_v17 = vpop.f32.mrf.mxu3 }
 0xaa2   :  { %v1078_v18 = vadd.f32 %v2306_v12, %v1077_v17 }
 0xaa4   :  { %v1081_v19 = vadd.f32 %v1078_v18, %v982_v45 }
 0xaa6   :  { %v1087_v20 = vsel %vm348_vm4, %v1081_v19, 0.0 }
 0xaa7   :  { %1088 = vadd.xlane.f32.xlu2 %v1087_v20 }
 0xb11   :  { %v1086_v21 = vpop.xlane.xlu1 %1085 }
 0xb12   :  { %v1090_v23 = vmul.f32 %v1086_v21, %v2992_v31 }
 0xb14   :  { %v1092_v24 = vsub.f32 %v1080_v15, %v1090_v23 }
 0xb16   :  { %v1094_v25 = vmul.f32 %v1092_v24, %v1092_v24 }
 0xb18   :  { %v1096_v26 = vsel %vm348_vm4, %v1094_v25, 0.0 }
 0xb19   :  { %1097 = vadd.xlane.f32.xlu0 %v1096_v26 }
 0xb1a   :  { %v1089_v27 = vpop.xlane.xlu2 %1088 }
 0xb1b   :  { %v1091_v29 = vmul.f32 %v1089_v27, %v2992_v31 }
 0xb1d   :  { %v1093_v30 = vsub.f32 %v1081_v19, %v1091_v29 }
 0xb1f   :  { %v1095_v32 = vmul.f32 %v1093_v30, %v1093_v30 }
 0xb21   :  { %v1099_v33 = vsel %vm348_vm4, %v1095_v32, 0.0 }
 0xb22   :  { %1100 = vadd.xlane.f32.xlu1 %v1099_v33 }
 0xb8c   :  { %v1098_v39 = vpop.xlane.xlu0 %1097 }
 0xb8d   :  { %v1102_v40 = vmul.f32 %v1098_v39, %v2992_v31 }
 0xb8f   :  { %v1104_v41 = vadd.f32 1e-12, %v1102_v40 }
 0xb91   :  { %2367 = vrsqrt.f32 %v1104_v41  ;;  %vm1112_vm9 = vweird.f32 %v1104_v41 }
 0xb95   :  { %v1101_v42 = vpop.xlane.xlu1 %1100 }
 0xb96   :  { %v1103_v43 = vmul.f32 %v1101_v42, %v2992_v31 }
 0xb97   :  { %v2368_v44 = vpop.eup %2367 }
 0xb98   :  { %v1107_v45 = vmul.f32 %v2368_v44, %v1104_v41  ;;  %v1105_v46 = vadd.f32 1e-12, %v1103_v43  ;;  %vm1113_vm8 = vweird.f32 %v2368_v44 }
 0xb99   :  { %vm1114_vm10 = vmor %vm1112_vm9, %vm1113_vm8 }
 0xb9a   :  { %v1108_v47 = vmul.f32 %v2368_v44, %v1107_v45  ;;  %2369 = vrsqrt.f32 %v1105_v46  ;;  %vm1122_vm15 = vweird.f32 %v1105_v46 }
 0xb9c   :  { %v1109_v48 = vmul.f32 0.5, %v1108_v47 }
 0xb9e   :  { %v1110_v49 = vsub.f32 1.5, %v1109_v48 }
 0xba0   :  { %v2370_v50 = vpop.eup %2369  ;;  %v1111_v51 = vmul.f32 %v2368_v44, %v1110_v49 }
 0xba1   :  { %v1117_v53 = vmul.f32 %v2370_v50, %v1105_v46  ;;  %vm1123_vm11 = vweird.f32 %v2370_v50 }
 0xba2   :  { %v1115_v54 = vsel %vm1114_vm10, %v2368_v44, %v1111_v51  ;;  %vm1124_vm1 = vmor %vm1122_vm15, %vm1123_vm11 }
 0xba3   :  { %v1126_v55 = vmul.f32 %v1115_v54, %v1092_v24  ;;  %v1118_v7 = vmul.f32 %v2370_v50, %v1117_v53 }
 0xba5   :  { %v1131_v57 = vmul.f32 %v2307_v52, %v1126_v55  ;;  %v1119_v58 = vmul.f32 0.5, %v1118_v7 }
 0xba7   :  { %v1120_v59 = vsub.f32 1.5, %v1119_v58  ;;  %v3178_v60 = vadd.f32 %v2308_v56, %v1131_v57 }
 0xba9   :  { %v1121_v61 = vmul.f32 %v2370_v50, %v1120_v59  ;;  %2147 = vmatmul.msk.f32.vlgmr.msrb.gmra.mxu1 %vm348_vm4, %v3178_v60 }
 0xbab   :  { %v1125_v8 = vsel %vm1124_vm1, %v2370_v50, %v1121_v61 }
 0xbac   :  { %v1127_v62 = vmul.f32 %v1125_v8, %v1093_v30 }
 0xbae   :  { %v1132_v63 = vmul.f32 %v2307_v52, %v1127_v62 }
 0xbb0   :  { %v3182_v0 = vadd.f32 %v2308_v56, %v1132_v63 }
 0xbb2   :  { %2148 = vmatmul.msk.f32.gmra.mxu1 %vm348_vm4, %v3182_v0 }
 0xc26   :  { %v1171_v2 = vpop.f32.mrf.mxu1 }
 0xc27   :  { %v3187_v3 = vadd.f32 %v2309_v1, %v1171_v2 }
 0xc29   :  { %1279 = vrot.lane.b32.xlu0 %v3187_v3, %s2743_s29  ;;  %1179 = vrot.lane.b32.xlu1 %v3187_v3, %s2740_s19 }
 0xc2f   :  { %v1174_v5 = vpop.f32.mrf.mxu1 }
 0xc30   :  { %v3193_v4 = vadd.f32 %v2309_v1, %v1174_v5 }
 0xc32   :  { %1381 = vrot.lane.b32.xlu1 %v3193_v4, %s2744_s26  ;;  %1281 = vrot.lane.b32.xlu0 %v3193_v4, %s2743_s29  ;;  %v2279_v56 = vpack.i.bf16 %v3187_v3, %v3193_v4 }
 0xc33   :  { %1181 = vrot.lane.b32.xlu2 %v3193_v4, %s2740_s19 }
 0xc3a   :  { %1479 = vrot.lane.b32.xlu1 %v3187_v3, %s2746_s20  ;;  %1379 = vrot.lane.b32.xlu0 %v3187_v3, %s2744_s26 }
 0xc3b   :  { %1275 = vrot.lane.b32.xlu2 %v3187_v3, %s2742_s23 }
 0xc42   :  { %1377 = vrot.lane.b32.xlu1 %v3193_v4, %s2745_s30  ;;  %1277 = vrot.lane.b32.xlu0 %v3193_v4, %s2742_s23 }
 0xc43   :  { %1481 = vrot.lane.b32.xlu2 %v3193_v4, %s2746_s20 }
 0xc4a   :  { %1475 = vrot.lane.b32.xlu0 %v3187_v3, %s2747_s1 }
 0xc4b   :  { %1375 = vrot.lane.b32.xlu2 %v3187_v3, %s2745_s30 }
 0xc53   :  { %1477 = vrot.lane.b32.xlu2 %v3193_v4, %s2747_s1 }
 0xc8d   :  { %v1182_v6 = vpop.permute.xlu2 %1181 }
 0xc8e   :  { %2149 = vmatpush.xpose.msk.msrb.mxu2 %vm463_vm12, %v1182_v6 }
 0xc95   :  { %v1276_v10 = vpop.permute.xlu2 %1275 }
 0xc9b   :  { %v1280_v34 = vpop.permute.xlu0 %1279  ;;  %v1180_v9 = vpop.permute.xlu1 %1179 }
 0xc9c   :  { %2150 = vmatpush.xpose.msk.msrb.mxu2 %vm463_vm12, %v1180_v9 }
 0xc9d   :  { %v1482_v13 = vpop.permute.xlu2 %1481 }
 0xc9f   :  { %2151 = vmatmul.msk.f32.vlgmr.msrb.gmra.mxu2 %vm463_vm12, %v3187_v3 }
 0xca4   :  { %v1282_v11 = vpop.permute.xlu0 %1281  ;;  %v1382_v12 = vpop.permute.xlu1 %1381 }
 0xca5   :  { %2155 = vmatpush.xpose.msk.msra.mxu3 %vm463_vm12, %v1282_v11  ;;  %2161 = vmatpush.xpose.msk.msra.mxu2 %vm463_vm12, %v1382_v12  ;;  %v1376_v16 = vpop.permute.xlu2 %1375 }
 0xca7   :  { %2152 = vmatmul.msk.f32.gmra.mxu2 %vm463_vm12, %v3193_v4 }
 0xca9   :  { %2156 = vmatpush.xpose.msk.msra.mxu3 %vm463_vm12, %v1280_v34 }
 0xcac   :  { %v1380_v14 = vpop.permute.xlu0 %1379  ;;  %2157 = vmatmul.msk.f32.vlgmr.msra.gmra.mxu3 %vm463_vm12, %v1276_v10  ;;  %v1480_v15 = vpop.permute.xlu1 %1479 }
 0xcad   :  { %2167 = vmatpush.xpose.msk.msrb.mxu3 %vm463_vm12, %v1482_v13  ;;  %2162 = vmatpush.xpose.msk.msra.mxu2 %vm463_vm12, %v1380_v14  ;;  %v1478_v20 = vpop.permute.xlu2 %1477 }
 0xcb0   :  { %2163 = vmatmul.msk.f32.vlgmr.msra.gmra.mxu2 %vm463_vm12, %v1376_v16 }
 0xcb1   :  { %2168 = vmatpush.xpose.msk.msrb.mxu3 %vm463_vm12, %v1480_v15 }
 0xcb4   :  { %v1278_v17 = vpop.permute.xlu0 %1277  ;;  %v1378_v18 = vpop.permute.xlu1 %1377 }
 0xcb5   :  { %2158 = vmatmul.msk.f32.gmra.mxu3 %vm463_vm12, %v1278_v17 }
 0xcb8   :  { %2164 = vmatmul.msk.f32.gmra.mxu2 %vm463_vm12, %v1378_v18 }
 0xcbc   :  { %v1476_v19 = vpop.permute.xlu0 %1475 }
 0xcbd   :  { %2169 = vmatmul.msk.f32.vlgmr.msrb.gmra.mxu3 %vm463_vm12, %v1476_v19 }
 0xcc5   :  { %2170 = vmatmul.msk.f32.gmra.mxu3 %vm463_vm12, %v1478_v20 }
 0xd22   :  { %v1208_v21 = vpop.f32.mrf.mxu2 }
 0xd23   :  { %v1214_v23 = vmul.f32 0.35355338, %v1208_v21 }
 0xd25   :  { %v1216_v24 = vadd.f32 %v1214_v23, %v3031_v22 }
 0xd27   :  { %v1218_v25 = vsel %vm499_vm13, %v1216_v24, -inf }
 0xd28   :  { %1219 = vmax.xlane.f32.xlu0 %v1218_v25 }
 0xd2a   :  { %v1211_v26 = vpop.f32.mrf.mxu2 }
 0xd2b   :  { %v1215_v27 = vmul.f32 0.35355338, %v1211_v26 }
 0xd2d   :  { %v1217_v29 = vadd.f32 %v1215_v27, %v3036_v28 }
 0xd2f   :  { %v1308_v30 = vpop.f32.mrf.mxu3  ;;  %v1221_v32 = vsel %vm499_vm13, %v1217_v29, -inf }
 0xd30   :  { %v1314_v33 = vmul.f32 0.35355338, %v1308_v30  ;;  %1222 = vmax.xlane.f32.xlu2 %v1221_v32 }
 0xd32   :  { %v1316_v35 = vadd.f32 %v1314_v33, %v3031_v22 }
 0xd33   :  { %v1408_v36 = vpop.f32.mrf.mxu2 }
 0xd34   :  { %v1414_v37 = vmul.f32 0.35355338, %v1408_v36  ;;  %v1318_v38 = vsel %vm499_vm13, %v1316_v35, -inf }
 0xd35   :  { %1319 = vmax.xlane.f32.xlu1 %v1318_v38 }
 0xd36   :  { %v1416_v39 = vadd.f32 %v1414_v37, %v3031_v22 }
 0xd38   :  { %v1311_v40 = vpop.f32.mrf.mxu3  ;;  %v1418_v41 = vsel %vm499_vm13, %v1416_v39, -inf }
 0xd39   :  { %v1315_v42 = vmul.f32 0.35355338, %v1311_v40  ;;  %1419 = vmax.xlane.f32.xlu0 %v1418_v41 }
 0xd3b   :  { %v1411_v43 = vpop.f32.mrf.mxu2  ;;  %v1317_v44 = vadd.f32 %v1315_v42, %v3036_v28 }
 0xd3c   :  { %v1415_v45 = vmul.f32 0.35355338, %v1411_v43 }
 0xd3d   :  { %v1321_v46 = vsel %vm499_vm13, %v1317_v44, -inf }
 0xd3e   :  { %1322 = vmax.xlane.f32.xlu2 %v1321_v46  ;;  %v3248_v49 = vadd.f32 %v1415_v45, %v3036_v28 }
 0xd40   :  { %v1508_v47 = vpop.f32.mrf.mxu3  ;;  %v1421_v52 = vsel %vm499_vm13, %v3248_v49, -inf }
 0xd41   :  { %v1514_v48 = vmul.f32 0.35355338, %v1508_v47 }
 0xd43   :  { %v1516_v50 = vadd.f32 %v1514_v48, %v3031_v22 }
 0xd45   :  { %v1518_v51 = vsel %vm499_vm13, %v1516_v50, -inf }
 0xd46   :  { %1519 = vmax.xlane.f32.xlu1 %v1518_v51  ;;  %1422 = vmax.xlane.f32.xlu2 %v1421_v52 }
 0xd48   :  { %v1511_v53 = vpop.f32.mrf.mxu3 }
 0xd49   :  { %v1515_v54 = vmul.f32 0.35355338, %v1511_v53 }
 0xd4b   :  { %v3255_v55 = vadd.f32 %v1515_v54, %v3036_v28 }
 0xd4d   :  { %v1521_v7 = vsel %vm499_vm13, %v3255_v55, -inf }
 0xd4e   :  { %1522 = vmax.xlane.f32.xlu0 %v1521_v7 }
 0xd62   :  { %2280 = vrot.lane.b32.xlu0 %v2279_v56, %s2741_s25 }
 0xd9b   :  { %v1220_v22 = vpop.xlane.xlu0 %1219 }
 0xd9c   :  { %v1224_v57 = vsub.f32 %v1216_v24, %v1220_v22 }
 0xd9e   :  { %v1226_v58 = vmul.f32 1.442695, %v1224_v57 }
 0xda0   :  { %2371 = vpow2.f32 %v1226_v58 }
 0xda3   :  { %v1223_v59 = vpop.xlane.xlu2 %1222 }
 0xda4   :  { %v1225_v61 = vsub.f32 %v1217_v29, %v1223_v59 }
 0xda6   :  { %v2372_v8 = vpop.eup %2371  ;;  %v1228_v62 = vmul.f32 1.442695, %v1225_v61 }
 0xda7   :  { %v1230_v28 = vsel %vm499_vm13, %v2372_v8, 0.0 }
 0xda8   :  { %2373 = vpow2.f32 %v1228_v62  ;;  %1231 = vadd.xlane.f32.xlu1 %v1230_v28  ;;  %v1320_v63 = vpop.xlane.xlu1 %1319 }
 0xda9   :  { %v1324_v1 = vsub.f32 %v1316_v35, %v1320_v63 }
 0xdab   :  { %v1326_v2 = vmul.f32 1.442695, %v1324_v1 }
 0xdac   :  { %v1420_v4 = vpop.xlane.xlu0 %1419 }
 0xdad   :  { %2375 = vpow2.f32 %v1326_v2  ;;  %v1424_v9 = vsub.f32 %v1416_v39, %v1420_v4 }
 0xdae   :  { %v2374_v5 = vpop.eup %2373 }
 0xdaf   :  { %v1233_v3 = vsel %vm499_vm13, %v2374_v5, 0.0  ;;  %v1426_v13 = vmul.f32 1.442695, %v1424_v9 }
 0xdb0   :  { %1234 = vadd.xlane.f32.xlu1 %v1233_v3 }
 0xdb1   :  { %v1323_v6 = vpop.xlane.xlu2 %1322 }
 0xdb2   :  { %v1325_v10 = vsub.f32 %v1317_v44, %v1323_v6 }
 0xdb3   :  { %v2376_v34 = vpop.eup %2375 }
 0xdb4   :  { %v1328_v11 = vmul.f32 1.442695, %v1325_v10  ;;  %v1330_v12 = vsel %vm499_vm13, %v2376_v34, 0.0 }
 0xdb5   :  { %1331 = vadd.xlane.f32.xlu2 %v1330_v12 }
 0xdb6   :  { %2377 = vpow2.f32 %v1328_v11 }
 0xdb7   :  { %2379 = vpow2.f32 %v1426_v13 }
 0xdb9   :  { %v1520_v14 = vpop.xlane.xlu1 %1519  ;;  %v1423_v29 = vpop.xlane.xlu2 %1422 }
 0xdba   :  { %v1524_v15 = vsub.f32 %v1516_v50, %v1520_v14  ;;  %v1425_v30 = vsub.f32 %v3248_v49, %v1423_v29 }
 0xdbc   :  { %v2378_v16 = vpop.eup %2377  ;;  %v1526_v17 = vmul.f32 1.442695, %v1524_v15  ;;  %v1428_v32 = vmul.f32 1.442695, %v1425_v30 }
 0xdbd   :  { %v1333_v18 = vsel %vm499_vm13, %v2378_v16, 0.0  ;;  %v2380_v19 = vpop.eup %2379 }
 0xdbe   :  { %1334 = vadd.xlane.f32.xlu1 %v1333_v18  ;;  %2381 = vpow2.f32 %v1526_v17  ;;  %v1430_v21 = vsel %vm499_vm13, %v2380_v19, 0.0  ;;  %v1608_v17 = vld [vmem:[#allocation7 + $0x30] sm:$0xff]  ;;  %v1607_v18 = vld [vmem:[#allocation7 + $0x28] sm:$0xff] }
 0xdbf   :  { %2383 = vpow2.f32 %v1428_v32 }
 0xdc1   :  { %v1523_v24 = vpop.xlane.xlu0 %1522 }
 0xdc2   :  { %v1525_v36 = vsub.f32 %v3255_v55, %v1523_v24 }
 0xdc4   :  { %v3266_v20 = vpop.eup %2381  ;;  %v1528_v37 = vmul.f32 1.442695, %v1525_v36  ;;  %v2310_v36 = vld [vmem:[%s3400_s11 + $0x1] ss:$0 sm:$0xff] }
 0xdc5   :  { %v1530_v23 = vsel %vm499_vm13, %v3266_v20, 0.0  ;;  %v2384_v33 = vpop.eup %2383 }
 0xdc6   :  { %1431 = vadd.xlane.f32.xlu1 %v1430_v21  ;;  %1531 = vadd.xlane.f32.xlu0 %v1530_v23  ;;  %v1433_v35 = vsel %vm499_vm13, %v2384_v33, 0.0  ;;  %2385 = vpow2.f32 %v1528_v37 }
 0xdcc   :  { %v2386_v38 = vpop.eup %2385 }
 0xdcd   :  { %2285 = vrot.lane.b32.xlu2 %v2279_v56, %s2748_s24  ;;  %v1533_v39 = vsel %vm499_vm13, %v2386_v38, 0.0 }
 0xdd4   :  { %v2281_v25 = vpop.permute.xlu0 %2280 }
 0xdd5   :  { %v2282_v26 = vunpack.i.l.bf16 %v2281_v25  ;;  %v2283_v27 = vunpack.i.h.bf16 %v2281_v25 }
 0xdd7   :  { %1266 = vmatpush.msra.mxu0 %v2282_v26 }
 0xdd9   :  { %1267 = vmatpush.msra.mxu0 %v2283_v27 }
 0xddf   :  { %2290 = vrot.lane.b32.xlu1 %v2279_v56, %s2750_s18 }
 0xde7   :  { %2295 = vrot.lane.b32.xlu1 %v2279_v56, %s2749_s10 }
 0xdf6   :  { %1434 = vadd.xlane.f32.xlu2 %v1433_v35 }
 0xe11   :  { %1534 = vadd.xlane.f32.xlu1 %v1533_v39 }
 0xe1b   :  { %v1232_v40 = vpop.xlane.xlu1 %1231 }
 0xe1c   :  { %2387 = vrcp.f32 %v1232_v40 }
 0xe22   :  { %v2388_v41 = vpop.eup %2387 }
 0xe23   :  { %v1238_v42 = vmul.f32 %v2388_v41, %v2372_v8  ;;  %v1235_v43 = vpop.xlane.xlu1 %1234 }
 0xe24   :  { %2389 = vrcp.f32 %v1235_v43 }
 0xe25   :  { %2153 = vmatmul.msk.f32.vlgmr.msra.gmra.mxu0 %vm499_vm13, %v1238_v42 }
 0xe28   :  { %v1332_v44 = vpop.xlane.xlu2 %1331 }
 0xe29   :  { %2391 = vrcp.f32 %v1332_v44 }
 0xe2a   :  { %v2390_v45 = vpop.eup %2389 }
 0xe2b   :  { %v1239_v46 = vmul.f32 %v2390_v45, %v2374_v5 }
 0xe2d   :  { %2154 = vmatmul.msk.f32.gmra.mxu0 %vm499_vm13, %v1239_v46 }
 0xe2f   :  { %v2392_v48 = vpop.eup %2391 }
 0xe30   :  { %v2286_v47 = vpop.permute.xlu2 %2285  ;;  %v1338_v52 = vmul.f32 %v2392_v48, %v2376_v34 }
 0xe31   :  { %v2287_v49 = vunpack.i.l.bf16 %v2286_v47  ;;  %v1335_v50 = vpop.xlane.xlu1 %1334  ;;  %v2288_v51 = vunpack.i.h.bf16 %v2286_v47 }
 0xe32   :  { %2393 = vrcp.f32 %v1335_v50 }
 0xe33   :  { %1366 = vmatpush.msra.mxu1 %v2287_v49 }
 0xe35   :  { %1367 = vmatpush.msra.mxu1 %v2288_v51 }
 0xe36   :  { %2159 = vmatmul.msk.f32.vlgmr.msra.gmra.mxu1 %vm499_vm13, %v1338_v52 }
 0xe38   :  { %v2394_v53 = vpop.eup %2393 }
 0xe39   :  { %v1339_v54 = vmul.f32 %v2394_v53, %v2378_v16  ;;  %v1432_v55 = vpop.xlane.xlu1 %1431  ;;  %v1532_v7 = vpop.xlane.xlu0 %1531  ;;  %v1609_v16 = vld [vmem:[#allocation7 + $0x38] sm:$0xff] }
 0xe3a   :  { %2395 = vrcp.f32 %v1432_v55  ;;  %1633 = vmatpush.msrb.mxu2 %v1609_v16  ;;  %v1706_v55 = vld [vmem:[#allocation12 + $0x28] sm:$0xff] }
 0xe3b   :  { %2397 = vrcp.f32 %v1532_v7  ;;  %v1705_v7 = vld [vmem:[#allocation12 + $0x20] sm:$0xff] }
 0xe3c   :  { %1634 = vmatpush.msrb.mxu2 %v1608_v17 }
 0xe3e   :  { %2160 = vmatmul.msk.f32.gmra.mxu1 %vm499_vm13, %v1339_v54  ;;  %1635 = vmatpush.msrb.mxu2 %v1607_v18  ;;  %v1707_v54 = vld [vmem:[#allocation12 + $0x30] sm:$0xff] }
 0xe40   :  { %v2396_v22 = vpop.eup %2395 }
 0xe41   :  { %v1438_v59 = vmul.f32 %v2396_v22, %v2380_v19  ;;  %v2398_v8 = vpop.eup %2397  ;;  %v1606_v19 = vld [vmem:[#allocation7 + $0x20] sm:$0xff] }
 0xe42   :  { %v1538_v63 = vmul.f32 %v2398_v8, %v3266_v20  ;;  %1636 = vmatpush.msrb.mxu2 %v1606_v19 }
 0xe51   :  { %v2291_v56 = vpop.permute.xlu1 %2290 }
 0xe52   :  { %v2292_v57 = vunpack.i.l.bf16 %v2291_v56  ;;  %v2293_v58 = vunpack.i.h.bf16 %v2291_v56 }
 0xe54   :  { %1466 = vmatpush.msrb.mxu0 %v2292_v57 }
 0xe56   :  { %1467 = vmatpush.msrb.mxu0 %v2293_v58 }
 0xe57   :  { %2165 = vmatmul.msk.f32.vlgmr.msrb.gmra.mxu0 %vm499_vm13, %v1438_v59 }
 0xe59   :  { %v2296_v61 = vpop.permute.xlu1 %2295 }
 0xe5a   :  { %v2297_v62 = vunpack.i.l.bf16 %v2296_v61  ;;  %v2298_v28 = vunpack.i.h.bf16 %v2296_v61 }
 0xe5c   :  { %1566 = vmatpush.msrb.mxu1 %v2297_v62 }
 0xe5e   :  { %1567 = vmatpush.msrb.mxu1 %v2298_v28 }
 0xe5f   :  { %2171 = vmatmul.msk.f32.vlgmr.msrb.gmra.mxu1 %vm499_vm13, %v1538_v63  ;;  %v2311_v63 = vld [vmem:[#allocation9 + $0x1] ss:$0 sm:$0xff] }
 0xe69   :  { %v1435_v1 = vpop.xlane.xlu2 %1434 }
 0xe6a   :  { %2399 = vrcp.f32 %v1435_v1 }
 0xe70   :  { %v2400_v2 = vpop.eup %2399 }
 0xe71   :  { %v1439_v5 = vmul.f32 %v2400_v2, %v2384_v33 }
 0xe73   :  { %2166 = vmatmul.msk.f32.gmra.mxu0 %vm499_vm13, %v1439_v5  ;;  %v2312_v5 = vld [vmem:[#allocation10 + $0x1] ss:$0 sm:$0xff] }
 0xe84   :  { %v1535_v3 = vpop.xlane.xlu1 %1534 }
 0xe85   :  { %2401 = vrcp.f32 %v1535_v3 }
 0xe8b   :  { %v2402_v4 = vpop.eup %2401 }
 0xe8c   :  { %v1539_v6 = vmul.f32 %v2402_v4, %v2386_v38 }
 0xe8e   :  { %2172 = vmatmul.msk.f32.gmra.mxu1 %vm499_vm13, %v1539_v6 }
 0xea2   :  { %v1269_v9 = vpop.f32.mrf.mxu0 }
 0xeaa   :  { %v1272_v11 = vpop.f32.mrf.mxu0 }
 0xeb3   :  { %v1369_v10 = vpop.f32.mrf.mxu1 }
 0xeb4   :  { %1577 = vrot.lane.b32.xlu0 %v1369_v10, %s2725_s2 }
 0xebb   :  { %v1372_v34 = vpop.f32.mrf.mxu1 }
 0xebc   :  { %1579 = vrot.lane.b32.xlu0 %v1372_v34, %s2725_s2  ;;  %s3406_s2 = sld [smem:[#allocation34_spill]] }
 0xed4   :  { %v1469_v12 = vpop.f32.mrf.mxu0 }
 0xed5   :  { %1585 = vrot.lane.b32.xlu2 %v1469_v12, %s2727_s22 }
 0xedc   :  { %v1569_v13 = vpop.f32.mrf.mxu1 }
 0xedd   :  { %1593 = vrot.lane.b32.xlu0 %v1569_v13, %s2751_s28 }
 0xef0   :  { %v1472_v14 = vpop.f32.mrf.mxu0 }
 0xef1   :  { %1587 = vrot.lane.b32.xlu2 %v1472_v14, %s2727_s22  ;;  %s3407_s22 = sld [smem:[#allocation35_spill]] }
 0xf0b   :  { %v1572_v15 = vpop.f32.mrf.mxu1 }
 0xf0c   :  { %1595 = vrot.lane.b32.xlu0 %v1572_v15, %s2751_s28 }
 0xf26   :  { %v1578_v20 = vpop.permute.xlu0 %1577 }
 0xf27   :  { %v1599_v24 = vsel %vm463_vm12, %v1269_v9, %v1578_v20  ;;  %v2186_v20 = vld [vmem:[%s3401_s15 + $0x78] sm:$0xff] }
 0xf28   :  { %1789 = vmatpush.msra.mxu3 %v2186_v20 }
 0xf2e   :  { %v1580_v21 = vpop.permute.xlu0 %1579 }
 0xf2f   :  { %v1586_v23 = vpop.permute.xlu2 %1585  ;;  %v1600_v30 = vsel %vm463_vm12, %v1272_v11, %v1580_v21  ;;  %v2185_v21 = vld [vmem:[%s3401_s15 + $0x70] sm:$0xff] }
 0xf30   :  { %v1601_v25 = vsel %vm499_vm13, %v1599_v24, %v1586_v23  ;;  %1790 = vmatpush.msra.mxu3 %v2185_v21  ;;  %v2184_v23 = vld [vmem:[%s3401_s15 + $0x68] sm:$0xff]  ;;  %v2183_v24 = vld [vmem:[%s3401_s15 + $0x60] sm:$0xff] }
 0xf32   :  { %1791 = vmatpush.msra.mxu3 %v2184_v23 }
 0xf34   :  { %1792 = vmatpush.msra.mxu3 %v2183_v24 }
 0xf4b   :  { %v1588_v29 = vpop.permute.xlu2 %1587 }
 0xf4c   :  { %v1602_v32 = vsel %vm499_vm13, %v1600_v30, %v1588_v29  ;;  %v2179_v29 = vld [vmem:[%s3401_s15 + $0x40] sm:$0xff] }
 0xf4d   :  { %v2313_v30 = vld [vmem:[%s3402_s17 + $0x1] ss:$0 sm:$0xff] }
 0xf4f   :  { %v1594_v26 = vpop.permute.xlu0 %1593 }
 0xf50   :  { %v1603_v27 = vsel %vm885_vm14, %v1601_v25, %v1594_v26  ;;  %v2182_v25 = vld [vmem:[%s3401_s15 + $0x58] sm:$0xff]  ;;  %v2181_v26 = vld [vmem:[%s3401_s15 + $0x50] sm:$0xff] }
 0xf51   :  { %2174 = vmatmul.msk.f32.vlgmr.msrb.gmra.mxu2 %vm348_vm4, %v1603_v27  ;;  %1793 = vmatpush.msra.mxu3 %v2182_v25  ;;  %v2180_v27 = vld [vmem:[%s3401_s15 + $0x48] sm:$0xff] }
 0xf53   :  { %1794 = vmatpush.msra.mxu3 %v2181_v26 }
 0xf55   :  { %1795 = vmatpush.msra.mxu3 %v2180_v27 }
 0xf57   :  { %1796 = vmatpush.msra.mxu3 %v2179_v29  ;;  %v2315_v29 = vld [vmem:[#allocation13 + $0x1] ss:$0 sm:$0xff] }
 0xf7e   :  { %v1596_v33 = vpop.permute.xlu0 %1595 }
 0xf7f   :  { %v1604_v35 = vsel %vm885_vm14, %v1602_v32, %v1596_v33 }
 0xf80   :  { %2175 = vmatmul.msk.f32.gmra.mxu2 %vm348_vm4, %v1604_v35 }
 0xfd4   :  { %v1638_v37 = vpop.f32.mrf.mxu2 }
 0xfd5   :  { %v1639_v38 = vadd.f32 %v2310_v36, %v1638_v37 }
 0xfd7   :  { %v1644_v39 = vadd.f32 %v1639_v38, %v3178_v60 }
 0xfd9   :  { %v1650_v40 = vsel %vm348_vm4, %v1644_v39, 0.0 }
 0xfda   :  { %1651 = vadd.xlane.f32.xlu1 %v1650_v40 }
0x1003   :  { %v1641_v41 = vpop.f32.mrf.mxu2 }
0x1004   :  { %v1642_v42 = vadd.f32 %v2310_v36, %v1641_v41 }
0x1006   :  { %v1645_v43 = vadd.f32 %v1642_v42, %v3182_v0  ;;  %v1708_v0 = vld [vmem:[#allocation12 + $0x38] sm:$0xff] }
0x1007   :  { %1732 = vmatpush.msra.mxu0 %v1708_v0 }
0x1008   :  { %v1653_v44 = vsel %vm348_vm4, %v1645_v43, 0.0 }
0x1009   :  { %1654 = vadd.xlane.f32.xlu2 %v1653_v44  ;;  %1733 = vmatpush.msra.mxu0 %v1707_v54  ;;  %v2314_v54 = vld [vmem:[%s3403_s6 + $0x1] ss:$0 sm:$0xff] }
0x100b   :  { %1734 = vmatpush.msra.mxu0 %v1706_v55 }
0x100d   :  { %1735 = vmatpush.msra.mxu0 %v1705_v7 }
0x104d   :  { %v1652_v45 = vpop.xlane.xlu1 %1651 }
0x104e   :  { %v1656_v46 = vmul.f32 %v1652_v45, %v2992_v31 }
0x1050   :  { %v1658_v47 = vsub.f32 %v1644_v39, %v1656_v46 }
0x1052   :  { %v1660_v48 = vmul.f32 %v1658_v47, %v1658_v47 }
0x1054   :  { %v1662_v49 = vsel %vm348_vm4, %v1660_v48, 0.0 }
0x1055   :  { %1663 = vadd.xlane.f32.xlu0 %v1662_v49 }
0x107c   :  { %v1655_v50 = vpop.xlane.xlu2 %1654 }
0x107d   :  { %v1657_v60 = vmul.f32 %v1655_v50, %v2992_v31 }
0x107f   :  { %v1659_v51 = vsub.f32 %v1645_v43, %v1657_v60 }
0x1081   :  { %v1661_v52 = vmul.f32 %v1659_v51, %v1659_v51 }
0x1083   :  { %v1665_v53 = vsel %vm348_vm4, %v1661_v52, 0.0 }
0x1084   :  { %1666 = vadd.xlane.f32.xlu1 %v1665_v53 }
0x10c8   :  { %v1664_v56 = vpop.xlane.xlu0 %1663 }
0x10c9   :  { %v1668_v22 = vmul.f32 %v1664_v56, %v2992_v31 }
0x10cb   :  { %v1670_v57 = vadd.f32 1e-12, %v1668_v22 }
0x10cd   :  { %2403 = vrsqrt.f32 %v1670_v57  ;;  %vm1678_vm14 = vweird.f32 %v1670_v57 }
0x10d3   :  { %v2404_v58 = vpop.eup %2403 }
0x10d4   :  { %v1673_v59 = vmul.f32 %v2404_v58, %v1670_v57  ;;  %vm1679_vm12 = vweird.f32 %v2404_v58 }
0x10d5   :  { %vm1680_vm2 = vmor %vm1678_vm14, %vm1679_vm12  ;;  %vm1867_vm12 = vcmask 1040384  }
0x10d6   :  { %v1674_v61 = vmul.f32 %v2404_v58, %v1673_v59 }
0x10d8   :  { %v1675_v8 = vmul.f32 0.5, %v1674_v61 }
0x10da   :  { %v1676_v62 = vsub.f32 1.5, %v1675_v8 }
0x10dc   :  { %v1677_v28 = vmul.f32 %v2404_v58, %v1676_v62 }
0x10de   :  { %v1681_v1 = vsel %vm1680_vm2, %v2404_v58, %v1677_v28 }
0x10df   :  { %v1692_v2 = vmul.f32 %v1681_v1, %v1658_v47 }
0x10e1   :  { %v1697_v3 = vmul.f32 %v2311_v63, %v1692_v2 }
0x10e3   :  { %v3311_v4 = vadd.f32 %v2312_v5, %v1697_v3 }
0x10e5   :  { %2177 = vmatmul.msk.f32.vlgmr.msra.gmra.mxu0 %vm348_vm4, %v3311_v4 }
0x10f7   :  { %v1667_v6 = vpop.xlane.xlu1 %1666 }
0x10f8   :  { %v1669_v10 = vmul.f32 %v1667_v6, %v2992_v31  ;;  %v1872_v6 = vld [vmem:[%s3405_s3 + $0x18] sm:$0xff] }
0x10f9   :  { %1892 = vmatpush.msra.mxu1 %v1872_v6 }
0x10fa   :  { %v1671_v34 = vadd.f32 1e-12, %v1669_v10 }
0x10fc   :  { %2405 = vrsqrt.f32 %v1671_v34  ;;  %vm1688_vm5 = vweird.f32 %v1671_v34 }
0x1102   :  { %v2406_v9 = vpop.eup %2405 }
0x1103   :  { %v1683_v11 = vmul.f32 %v2406_v9, %v1671_v34  ;;  %vm1689_vm3 = vweird.f32 %v2406_v9 }
0x1104   :  { %vm1690_vm6 = vmor %vm1688_vm5, %vm1689_vm3 }
0x1105   :  { %v1684_v12 = vmul.f32 %v2406_v9, %v1683_v11  ;;  %v1870_v11 = vld [vmem:[%s3405_s3 + $0x8] sm:$0xff] }
0x1107   :  { %v1685_v13 = vmul.f32 0.5, %v1684_v12 }
0x1109   :  { %v1686_v14 = vsub.f32 1.5, %v1685_v13  ;;  %v1869_v13 = vld [vmem:[%s3405_s3] sm:$0xff] }
0x110b   :  { %v1687_v15 = vmul.f32 %v2406_v9, %v1686_v14 }
0x110d   :  { %v1691_v16 = vsel %vm1690_vm6, %v2406_v9, %v1687_v15  ;;  %v1871_v9 = vld [vmem:[%s3405_s3 + $0x10] sm:$0xff] }
0x110e   :  { %v1693_v17 = vmul.f32 %v1691_v16, %v1659_v51  ;;  %1893 = vmatpush.msra.mxu1 %v1871_v9  ;;  %v2000_v9 = vld [vmem:[%s2895_s9 + $0x28] sm:$0xff] }
0x1110   :  { %v1698_v18 = vmul.f32 %v2311_v63, %v1693_v17  ;;  %1894 = vmatpush.msra.mxu1 %v1870_v11  ;;  %v1997_v11 = vld [vmem:[%s2895_s9 + $0x10] sm:$0xff] }
0x1112   :  { %v1703_v19 = vadd.f32 %v2312_v5, %v1698_v18  ;;  %1895 = vmatpush.msra.mxu1 %v1869_v13  ;;  %v1995_v13 = vld [vmem:[%s2895_s9] sm:$0xff] }
0x1114   :  { %2178 = vmatmul.msk.f32.gmra.mxu0 %vm348_vm4, %v1703_v19 }
0x1162   :  { %v1737_v32 = vpop.f32.mrf.mxu0 }
0x1163   :  { %v1738_v33 = vadd.f32 %v2313_v30, %v1737_v32 }
0x1165   :  { %v1745_v35 = vmul.f32 0.044715, %v1738_v33  ;;  %v1743_v41 = vmul.f32 0.5, %v1738_v33 }
0x1167   :  { %v1747_v36 = vmul.f32 %v1745_v35, %v1738_v33  ;;  %v2316_v35 = vld [vmem:[%s3404_s16 + $0x1] ss:$0 sm:$0xff] }
0x1169   :  { %v1749_v37 = vmul.f32 %v1747_v36, %v1738_v33 }
0x116b   :  { %v1751_v38 = vadd.f32 %v1749_v37, %v1738_v33 }
0x116d   :  { %v1753_v39 = vmul.f32 0.7978846, %v1751_v38 }
0x116f   :  { %2407 = vtanh.f32 %v1753_v39 }
0x1175   :  { %v2408_v40 = vpop.eup %2407 }
0x1176   :  { %v1757_v42 = vadd.f32 1.0, %v2408_v40 }
0x1178   :  { %v1759_v43 = vmul.f32 %v1757_v42, %v1743_v41 }
0x117a   :  { %2188 = vmatmul.msk.f32.vlgmr.msra.gmra.mxu3 %vm1050_vm7, %v1759_v43 }
0x1191   :  { %v1740_v44 = vpop.f32.mrf.mxu0 }
0x1192   :  { %v1741_v45 = vadd.f32 %v2313_v30, %v1740_v44  ;;  %v1904_v44 = vld [vmem:[%s3406_s2 + $0x18] sm:$0xff] }
0x1193   :  { %1924 = vmatpush.msra.mxu2 %v1904_v44 }
0x1194   :  { %v1746_v46 = vmul.f32 0.044715, %v1741_v45  ;;  %v1744_v51 = vmul.f32 0.5, %v1741_v45 }
0x1196   :  { %v1748_v47 = vmul.f32 %v1746_v46, %v1741_v45  ;;  %v1902_v46 = vld [vmem:[%s3406_s2 + $0x8] sm:$0xff] }
0x1198   :  { %v1750_v48 = vmul.f32 %v1748_v47, %v1741_v45  ;;  %v1901_v47 = vld [vmem:[%s3406_s2] sm:$0xff] }
0x119a   :  { %v1752_v49 = vadd.f32 %v1750_v48, %v1741_v45  ;;  %v1903_v45 = vld [vmem:[%s3406_s2 + $0x10] sm:$0xff]  ;;  %v1934_v48 = vld [vmem:[#allocation16 + $0x8] sm:$0xff] }
0x119b   :  { %1925 = vmatpush.msra.mxu2 %v1903_v45  ;;  %1956 = vmatpush.msrb.mxu0 %v1934_v48 }
0x119c   :  { %v1754_v50 = vmul.f32 0.7978846, %v1752_v49  ;;  %v2317_v49 = vld [vmem:[#allocation15] ss:$0 sm:$0xff] }
0x119d   :  { %1926 = vmatpush.msra.mxu2 %v1902_v46 }
0x119e   :  { %2409 = vtanh.f32 %v1754_v50 }
0x119f   :  { %1927 = vmatpush.msra.mxu2 %v1901_v47 }
0x11a4   :  { %v2410_v60 = vpop.eup %2409 }
0x11a5   :  { %v1758_v52 = vadd.f32 1.0, %v2410_v60 }
0x11a7   :  { %v1760_v53 = vmul.f32 %v1758_v52, %v1744_v51  ;;  %v1933_v52 = vld [vmem:[#allocation16] sm:$0xff] }
0x11a8   :  { %1957 = vmatpush.msrb.mxu0 %v1933_v52 }
0x11a9   :  { %2189 = vmatmul.msk.f32.gmra.mxu3 %vm1050_vm7, %v1760_v53  ;;  %v1966_v53 = vld [vmem:[#allocation18 + $0x18] sm:$0xff] }
0x11aa   :  { %1986 = vmatpush.msrb.mxu1 %v1966_v53 }
0x11fd   :  { %v1798_v0 = vpop.f32.mrf.mxu3 }
0x11fe   :  { %v1799_v22 = vadd.f32 %v2314_v54, %v1798_v0  ;;  %v2318_v0 = vld [vmem:[%s3407_s22] ss:$0 sm:$0xff] }
0x1200   :  { %v1804_v58 = vadd.f32 %v1799_v22, %v3311_v4  ;;  %v1964_v22 = vld [vmem:[#allocation18 + $0x8] sm:$0xff] }
0x1202   :  { %v1810_v59 = vsel %vm348_vm4, %v1804_v58, 0.0 }
0x122c   :  { %v1801_v55 = vpop.f32.mrf.mxu3 }
0x122d   :  { %v1802_v7 = vadd.f32 %v2314_v54, %v1801_v55 }
0x122f   :  { %v1805_v56 = vadd.f32 %v1802_v7, %v1703_v19 }
0x1231   :  { %v1813_v57 = vsel %vm348_vm4, %v1805_v56, 0.0 }
0x1232   :  { %1814 = vadd.xlane.f32.xlu1 %v1813_v57  ;;  %v1963_v57 = vld [vmem:[#allocation18] sm:$0xff] }
0x123a   :  { %1811 = vadd.xlane.f32.xlu1 %v1810_v59  ;;  %v2010_v59 = vld [vmem:[%s2895_s9 + $0x78] sm:$0xff] }
0x123b   :  { %2048 = vmatpush.msrb.mxu2 %v2010_v59 }
0x12a5   :  { %v1815_v61 = vpop.xlane.xlu1 %1814 }
0x12a6   :  { %v1817_v8 = vmul.f32 %v1815_v61, %v2992_v31  ;;  %v2007_v61 = vld [vmem:[%s2895_s9 + $0x60] sm:$0xff] }
0x12a8   :  { %v1819_v62 = vsub.f32 %v1805_v56, %v1817_v8  ;;  %v1965_v56 = vld [vmem:[#allocation18 + $0x10] sm:$0xff]  ;;  %v2008_v8 = vld [vmem:[%s2895_s9 + $0x68] sm:$0xff] }
0x12a9   :  { %1987 = vmatpush.msrb.mxu1 %v1965_v56  ;;  %2049 = vmatpush.msrb.mxu2 %v2008_v8 }
0x12aa   :  { %v1821_v28 = vmul.f32 %v1819_v62, %v1819_v62 }
0x12ab   :  { %1988 = vmatpush.msrb.mxu1 %v1964_v22 }
0x12ac   :  { %v1825_v63 = vsel %vm348_vm4, %v1821_v28, 0.0  ;;  %v2006_v28 = vld [vmem:[%s2895_s9 + $0x58] sm:$0xff] }
0x12ad   :  { %1826 = vadd.xlane.f32.xlu1 %v1825_v63  ;;  %v1812_v1 = vpop.xlane.xlu1 %1811  ;;  %1989 = vmatpush.msrb.mxu1 %v1963_v57  ;;  %v2003_v63 = vld [vmem:[%s2895_s9 + $0x40] sm:$0xff] }
0x12ae   :  { %v1816_v2 = vmul.f32 %v1812_v1, %v2992_v31  ;;  %v2004_v1 = vld [vmem:[%s2895_s9 + $0x48] sm:$0xff]  ;;  %2050 = vmatpush.msrb.mxu2 %v2006_v28 }
0x12b0   :  { %v1818_v5 = vsub.f32 %v1804_v58, %v1816_v2  ;;  %v2009_v58 = vld [vmem:[%s2895_s9 + $0x70] sm:$0xff]  ;;  %2051 = vmatpush.msrb.mxu2 %v2004_v1 }
0x12b1   :  { %2028 = vmatpush.msrb.mxu3 %v2009_v58  ;;  %v2001_v2 = vld [vmem:[%s2895_s9 + $0x30] sm:$0xff] }
0x12b2   :  { %v1820_v3 = vmul.f32 %v1818_v5, %v1818_v5 }
0x12b3   :  { %2029 = vmatpush.msrb.mxu3 %v2007_v61 }
0x12b4   :  { %v1822_v4 = vsel %vm348_vm4, %v1820_v3, 0.0  ;;  %v2319_v3 = vld [vmem:[%s3408_s7] ss:$0 sm:$0xff] }
0x12b5   :  { %1823 = vadd.xlane.f32.xlu1 %v1822_v4 }
0x1320   :  { %v1827_v10 = vpop.xlane.xlu1 %1826 }
0x1321   :  { %v1829_v34 = vmul.f32 %v1827_v10, %v2992_v31 }
0x1323   :  { %v1831_v12 = vadd.f32 1e-12, %v1829_v34  ;;  %v1999_v34 = vld [vmem:[%s2895_s9 + $0x20] sm:$0xff] }
0x1325   :  { %2411 = vrsqrt.f32 %v1831_v12  ;;  %vm1848_vm9 = vweird.f32 %v1831_v12 }
0x1328   :  { %v1824_v14 = vpop.xlane.xlu1 %1823 }
0x1329   :  { %v1828_v15 = vmul.f32 %v1824_v14, %v2992_v31  ;;  %v1996_v14 = vld [vmem:[%s2895_s9 + $0x8] sm:$0xff] }
0x132b   :  { %v2412_v16 = vpop.eup %2411  ;;  %v1830_v17 = vadd.f32 1e-12, %v1828_v15  ;;  %v2320_v15 = vld [vmem:[%s2890_s12] ss:$0 sm:$0xff] }
0x132c   :  { %v1843_v18 = vmul.f32 %v2412_v16, %v1831_v12  ;;  %vm1849_vm8 = vweird.f32 %v2412_v16  ;;  %v1998_v12 = vld [vmem:[%s2895_s9 + $0x18] sm:$0xff] }
0x132d   :  { %2413 = vrsqrt.f32 %v1830_v17  ;;  %vm1850_vm10 = vmor %vm1848_vm9, %vm1849_vm8  ;;  %vm1838_vm15 = vweird.f32 %v1830_v17 }
0x132e   :  { %v1844_v19 = vmul.f32 %v2412_v16, %v1843_v18 }
0x1330   :  { %v1845_v20 = vmul.f32 0.5, %v1844_v19  ;;  %v2011_v19 = vld [vmem:[%s2900_s13] sm:$0x3] }
0x1332   :  { %v1846_v21 = vsub.f32 1.5, %v1845_v20  ;;  %v2014_v20 = vperm.slane %v2011_v19, 1 }
0x1333   :  { %v2414_v23 = vpop.eup %2413 }
0x1334   :  { %v1847_v24 = vmul.f32 %v2412_v16, %v1846_v21  ;;  %v1833_v25 = vmul.f32 %v2414_v23, %v1830_v17  ;;  %vm1839_vm11 = vweird.f32 %v2414_v23  ;;  %v2013_v21 = vperm.slane %v2011_v19, 0 }
0x1335   :  { %vm1840_vm1 = vmor %vm1838_vm15, %vm1839_vm11 }
0x1336   :  { %v1851_v26 = vsel %vm1850_vm10, %v2412_v16, %v1847_v24  ;;  %v1834_v27 = vmul.f32 %v2414_v23, %v1833_v25 }
0x1337   :  { %v1853_v30 = vmul.f32 %v1851_v26, %v1819_v62  ;;  %v2005_v62 = vld [vmem:[%s2895_s9 + $0x50] sm:$0xff] }
0x1338   :  { %v1835_v32 = vmul.f32 0.5, %v1834_v27  ;;  %2030 = vmatpush.msrb.mxu3 %v2005_v62 }
0x1339   :  { %v1858_v33 = vmul.f32 %v2315_v29, %v1853_v30 }
0x133a   :  { %v1836_v31 = vsub.f32 1.5, %v1835_v32  ;;  %2031 = vmatpush.msrb.mxu3 %v2003_v63 }
0x133b   :  { %v1863_v39 = vadd.f32 %v2316_v35, %v1858_v33 }
0x133c   :  { %v1837_v36 = vmul.f32 %v2414_v23, %v1836_v31  ;;  %2032 = vmatpush.msrb.mxu3 %v2001_v2 }
0x133d   :  { %v1865_v42 = vrot.slane %v1863_v39, 7 }
0x133e   :  { %v1841_v37 = vsel %vm1840_vm1, %v2414_v23, %v1837_v36  ;;  %2033 = vmatpush.msrb.mxu3 %v1999_v34 }
0x133f   :  { %v1852_v38 = vmul.f32 %v1841_v37, %v1818_v5  ;;  %v2002_v5 = vld [vmem:[%s2895_s9 + $0x38] sm:$0xff] }
0x1340   :  { %2052 = vmatpush.msrb.mxu2 %v2002_v5  ;;  %2034 = vmatpush.msrb.mxu3 %v1997_v11 }
0x1341   :  { %v1857_v40 = vmul.f32 %v2315_v29, %v1852_v38 }
0x1342   :  { %2053 = vmatpush.msrb.mxu2 %v2000_v9  ;;  %2035 = vmatpush.msrb.mxu3 %v1995_v13 }
0x1343   :  { %v1862_v41 = vadd.f32 %v2316_v35, %v1857_v40 }
0x1344   :  { %2054 = vmatpush.msrb.mxu2 %v1998_v12 }
0x1345   :  { %v1868_v43 = vsel %vm1867_vm12, %v1862_v41, %v1865_v42 }
0x1346   :  { %2191 = vmatmul.msk.f32.vlgmr.msra.gmra.mxu1 %vm348_vm4, %v1868_v43  ;;  %2055 = vmatpush.msrb.mxu2 %v1996_v14 }
0x13c3   :  { %v1897_v50 = vpop.f32.mrf.mxu1 }
0x13c4   :  { %v1898_v60 = vadd.f32 %v2317_v49, %v1897_v50 }
0x13c6   :  { %2415 = vtanh.f32 %v1898_v60 }
0x13cc   :  { %v2416_v51 = vpop.eup %2415 }
0x13cd   :  { %2192 = vmatmul.msk.f32.vlgmr.msra.gmra.mxu2 %vm348_vm4, %v2416_v51 }
0x1450   :  { %v1929_v54 = vpop.f32.mrf.mxu2 }
0x1451   :  { %v1930_v55 = vadd.f32 %v2318_v0, %v1929_v54 }
0x1453   :  { %v1932_v7 = vmax.f32 %v1930_v55, 0.0 }
0x1455   :  { %2193 = vmatmul.msk.f32.vlgmr.msrb.gmra.mxu0 %vm499_vm13, %v1932_v7 }
0x14d2   :  { %v1959_v4 = vpop.f32.mrf.mxu0 }
0x14d3   :  { %v1960_v6 = vadd.f32 %v2319_v3, %v1959_v4 }
0x14d5   :  { %v1962_v10 = vmax.f32 %v1960_v6, 0.0 }
0x14d7   :  { %2194 = vmatmul.msk.f32.vlgmr.msrb.gmra.mxu1 %vm348_vm4, %v1962_v10 }
0x1554   :  { %v1991_v16 = vpop.f32.mrf.mxu1 }
0x1555   :  { %v1992_v17 = vadd.f32 %v2320_v15, %v1991_v16 }
0x1557   :  { %v1994_v18 = vmax.f32 %v1992_v17, 0.0 }
0x1559   :  { %2195 = vmatmul.msk.f32.vlgmr.msrb.gmra.mxu3 %vm1050_vm7, %v1994_v18  ;;  %2196 = vmatmul.msk.f32.vlgmr.msrb.gmra.mxu2 %vm1050_vm7, %v1994_v18 }
0x15dc   :  { %v2037_v23 = vpop.f32.mrf.mxu3  ;;  %v2057_v24 = vpop.f32.mrf.mxu2 }
0x15dd   :  { %v2058_v25 = vadd.f32 %v2057_v24, %v2014_v20  ;;  %v2038_v26 = vadd.f32 %v2037_v23, %v2013_v21 }
0x15df   :  { %v2062_v27 = vrot.slane %v2058_v25, 6 }
0x15e1   :  { %v2063_v29 = vsel %vm319_vm0, %v2038_v26, %v2062_v27 }
0x15e2   :  { %2065 = vst [vmem:[%s2905_s8] sm:$0xf] %v2063_v29 }
0x15e3   :  { %2070 = vsyncpa [#allocation3], 1 }
0x15e4   :  { %2071 = vsyncpa [#allocation5], 1 }
0x15e5   :  { %2072 = vsyncpa [#allocation8], 1 }
0x15e6   :  { %2073 = vsyncpa [#allocation11], 1 }
0x15e7   :  { %2074 = vsyncpa [#allocation14], 1 }
0x15e8   :  { %2075 = vsyncpa [#allocation17], 1 }

</bundles_post_ra>
